<compile_context>
chip_gen: v5e
topology: v5e:2x2
jax: 0.10.0
libtpu: 0.0.40
codegen_flags: <defaults>
</compile_context>

<pallas_src>
import math
import functools

import jax
import jax.numpy as jnp
from jax.experimental import pallas as pl
from jax.experimental.pallas import tpu as pltpu


def _encoder_layer_kernel(
    x_ref, mask_ref,
    wq_ref, bq_ref, wk_ref, bk_ref, wv_ref, bv_ref, wo_ref, bo_ref,
    g1_ref, be1_ref, w1_ref, b1_ref, w2_ref, b2_ref, g2_ref, be2_ref,
    wh_ref, bh_ref,
    out_ref, head_ref,
    *, num_heads, d_key, d_value, act,
):
    Bb, S, D = x_ref.shape
    M = Bb * S                                         # batch rows folded into M

    x_f32 = x_ref[...].astype(jnp.float32)             # (Bb, S, D)
    x2_f32 = x_f32.reshape(M, D)
    x2_bf = x2_f32.astype(jnp.bfloat16)

    # Hoist the mask compare out of the head loop; keep exact masked_fill
    # semantics (fully-masked rows degrade to uniform, as in PyTorch).
    masked = mask_ref[...] == 0                        # (Bb, S, S) bool

    inv_sqrt_dk = 1.0 / math.sqrt(d_key)

    def layer_norm(v, g_ref, b_ref):                   # f32 stats
        mu = jnp.mean(v, axis=-1, keepdims=True)
        var = jnp.mean((v - mu) ** 2, axis=-1, keepdims=True)
        return (v - mu) * jax.lax.rsqrt(var + 1e-5) * g_ref[...] + b_ref[...]

    # --- multi-head attention -------------------------------------------
    attn_out = jnp.zeros((M, D), jnp.float32)          # per-head accumulated proj
    ctx_parts = []                                     # f32 contexts for classifier
    for h in range(num_heads):                         # static unroll over heads
        # projections: leading-axis (free) weight slices, bf16 ops, f32 acc
        qh = jnp.dot(x2_bf, wq_ref[h], preferred_element_type=jnp.float32) + bq_ref[h]
        kh = jnp.dot(x2_bf, wk_ref[h], preferred_element_type=jnp.float32) + bk_ref[h]
        vh = jnp.dot(x2_bf, wv_ref[h], preferred_element_type=jnp.float32) + bv_ref[h]

        qh3 = qh.reshape(Bb, S, d_key).astype(jnp.bfloat16)
        kh3 = kh.reshape(Bb, S, d_key).astype(jnp.bfloat16)
        vh3 = vh.reshape(Bb, S, d_value).astype(jnp.bfloat16)

        s = jnp.einsum('bqd,bkd->bqk', qh3, kh3,
                       preferred_element_type=jnp.float32) * inv_sqrt_dk
        s = jnp.where(masked, -1e9, s)                 # f32 masking
        s = s - jnp.max(s, axis=-1, keepdims=True)
        p = jnp.exp(s)
        p = p * pl.reciprocal(jnp.sum(p, axis=-1, keepdims=True), approx=True)
        # TODO(synk): attention/residual dropout omitted (eval-mode semantics).

        ch = jnp.einsum('bqk,bkd->bqd', p.astype(jnp.bfloat16), vh3,
                        preferred_element_type=jnp.float32)      # (Bb, S, dv) f32
        ctx_parts.append(ch)

        # accumulate output projection per head into a lane-dense (M, D) acc
        attn_out = attn_out + jnp.dot(
            ch.reshape(M, d_value).astype(jnp.bfloat16), wo_ref[h],
            preferred_element_type=jnp.float32)

    attn_out = attn_out + bo_ref[...]

    # --- residual + layernorm 1 (f32) ------------------------------------
    res1 = layer_norm(attn_out + x2_f32, g1_ref, be1_ref)

    # --- FFN (bf16 matmuls, f32 epilogue) ---------------------------------
    h1 = jnp.dot(res1.astype(jnp.bfloat16), w1_ref[...],
                 preferred_element_type=jnp.float32) + b1_ref[...]
    if act == "relu":
        h1 = jnp.maximum(h1, 0.0)
    else:  # exact GELU, matches torch.nn.GELU()
        h1 = 0.5 * h1 * (1.0 + jax.lax.erf(h1 / math.sqrt(2.0)))
    h2 = jnp.dot(h1.astype(jnp.bfloat16), w2_ref[...],
                 preferred_element_type=jnp.float32) + b2_ref[...]

    # --- residual + layernorm 2 -------------------------------------------
    out = layer_norm(h2 + res1, g2_ref, be2_ref)
    out_ref[...] = out.reshape(Bb, S, D).astype(out_ref.dtype)

    # --- head classifier: one stacked matmul over all heads ---------------
    ctx_all = jnp.concatenate(ctx_parts, axis=1)       # (Bb, H*S, dv) f32
    head = jnp.dot(ctx_all.reshape(M * num_heads, d_value).astype(jnp.bfloat16),
                   wh_ref[...], preferred_element_type=jnp.float32) + bh_ref[...]
    head_ref[...] = head.reshape(Bb, num_heads * S, num_heads).astype(head_ref.dtype)


def _prep_weights(params, num_heads, d_key, d_value):
    """Reshape per-head weights (head-leading axis) and cast matmul weights to bf16."""
    D = params["wq"].shape[0]
    H = num_heads
    bf, f32 = jnp.bfloat16, jnp.float32
    wq3 = params["wq"].reshape(D, H, d_key).transpose(1, 0, 2).astype(bf)     # (H, D, dk)
    wk3 = params["wk"].reshape(D, H, d_key).transpose(1, 0, 2).astype(bf)
    wv3 = params["wv"].reshape(D, H, d_value).transpose(1, 0, 2).astype(bf)
    bq3 = params["bq"].reshape(H, 1, d_key).astype(f32)
    bk3 = params["bk"].reshape(H, 1, d_key).astype(f32)
    bv3 = params["bv"].reshape(H, 1, d_value).astype(f32)
    wo3 = params["wo"].reshape(H, d_value, D).astype(bf)                      # (H, dv, D)
    return [
        wq3, bq3, wk3, bk3, wv3, bv3, wo3,
        params["bo"].astype(f32),
        params["g1"].astype(f32), params["be1"].astype(f32),
        params["w1"].astype(bf), params["b1"].astype(f32),
        params["w2"].astype(bf), params["b2"].astype(f32),
        params["g2"].astype(f32), params["be2"].astype(f32),
        params["wh"].astype(bf), params["bh"].astype(f32),
    ]


def encoder_layer(x, mask, params, *, num_heads, d_key, d_value, act, block_b=None):
    B, S, D = x.shape
    H = num_heads
    # The head classifier is applied to d_value-wide contexts but its weight
    # has d_key input rows (the PyTorch module implicitly assumes equality).
    assert d_key == d_value, "head_classifier assumes d_key == d_value"

    if block_b is None:
        # Fold several batch rows into the MXU M dimension (~256 rows/step),
        # using a clean divisor of B. In-kernel (Bb,S,*)->(Bb*S,*) reshapes
        # need S % 8 == 0 when Bb > 1.
        if S % 8 == 0:
            target = max(1, 256 // S)
            block_b = max(d for d in range(1, B + 1) if B % d == 0 and d <= target)
        else:
            block_b = 1
    assert B % block_b == 0

    weights = _prep_weights(params, num_heads, d_key, d_value)

    def full_spec(a):
        nd = a.ndim
        return pl.BlockSpec(a.shape, lambda b, _nd=nd: (0,) * _nd)

    kernel = functools.partial(
        _encoder_layer_kernel,
        num_heads=num_heads, d_key=d_key, d_value=d_value, act=act)

    out, head_hm = pl.pallas_call(
        kernel,
        out_shape=(
            jax.ShapeDtypeStruct((B, S, D), x.dtype),
            jax.ShapeDtypeStruct((B, H * S, H), x.dtype),
        ),
        grid_spec=pltpu.PrefetchScalarGridSpec(
            num_scalar_prefetch=0,
            grid=(B // block_b,),
            in_specs=[
                pl.BlockSpec((block_b, S, D), lambda b: (b, 0, 0)),
                pl.BlockSpec((block_b, S, S), lambda b: (b, 0, 0)),
            ] + [full_spec(w) for w in weights],
            out_specs=(
                pl.BlockSpec((block_b, S, D), lambda b: (b, 0, 0)),
                pl.BlockSpec((block_b, H * S, H), lambda b: (b, 0, 0)),
            ),
        ),
        # Batch steps are fully independent -> "parallel" (v7x dual-TC sharding).
        compiler_params=pltpu.CompilerParams(dimension_semantics=("parallel",)),
    )(x, mask, *weights)

    # reorder head-major (B, H, S, nh) -> (B, S, H, nh) to match PyTorch
    head = head_hm.reshape(B, H, S, H).transpose(0, 2, 1, 3)
    return out, head


def init_params(key, hidden, num_heads, d_key, d_value, inner):
    ks = jax.random.split(key, 6)

    def lin(k, fan_in, fan_out):
        bound = 1.0 / math.sqrt(fan_in)
        kw, kb = jax.random.split(k)
        w = jax.random.uniform(kw, (fan_in, fan_out), jnp.float32, -bound, bound)
        b = jax.random.uniform(kb, (1, fan_out), jnp.float32, -bound, bound)
        return w, b

    p = {}
    p["wq"], p["bq"] = lin(ks[0], hidden, d_key * num_heads)
    p["wk"], p["bk"] = lin(ks[1], hidden, d_key * num_heads)
    p["wv"], p["bv"] = lin(ks[2], hidden, d_value * num_heads)
    p["wo"], p["bo"] = lin(ks[3], d_key * num_heads, hidden)
    p["g1"], p["be1"] = jnp.ones((1, hidden), jnp.float32), jnp.zeros((1, hidden), jnp.float32)
    p["w1"], p["b1"] = lin(ks[4], hidden, inner)
    p["w2"], p["b2"] = lin(ks[5], inner, hidden)
    p["g2"], p["be2"] = jnp.ones((1, hidden), jnp.float32), jnp.zeros((1, hidden), jnp.float32)
    kh = jax.random.fold_in(key, 99)
    p["wh"], p["bh"] = lin(kh, d_key, num_heads)
    return p


def reference(x, mask, p, *, num_heads, d_key, d_value, act):
    """Pure-JAX f32 reference mirroring the PyTorch forward (eval mode)."""
    B, S, D = x.shape

    def ln(v, g, b):
        mu = v.mean(-1, keepdims=True)
        var = ((v - mu) ** 2).mean(-1, keepdims=True)
        return (v - mu) / jnp.sqrt(var + 1e-5) * g[0] + b[0]

    q = (x @ p["wq"] + p["bq"][0]).reshape(B, S, num_heads, d_key).transpose(0, 2, 1, 3)
    k = (x @ p["wk"] + p["bk"][0]).reshape(B, S, num_heads, d_key).transpose(0, 2, 1, 3)
    v = (x @ p["wv"] + p["bv"][0]).reshape(B, S, num_heads, d_value).transpose(0, 2, 1, 3)
    scores = (q @ k.transpose(0, 1, 3, 2)) / math.sqrt(d_key)
    scores = jnp.where(mask[:, None, :, :] == 0, -1e9, scores)
    attn = jax.nn.softmax(scores, axis=-1)
    ctx = attn @ v                                      # (B, H, S, dv)
    ctx_s = ctx.transpose(0, 2, 1, 3)                   # (B, S, H, dv)
    attn_out = ctx_s.reshape(B, S, num_heads * d_value) @ p["wo"] + p["bo"][0]
    res1 = ln(attn_out + x, p["g1"], p["be1"])
    h1 = res1 @ p["w1"] + p["b1"][0]
    h1 = jnp.maximum(h1, 0.0) if act == "relu" else jax.nn.gelu(h1, approximate=False)
    h2 = h1 @ p["w2"] + p["b2"][0]
    res2 = ln(h2 + res1, p["g2"], p["be2"])
    head = ctx_s @ p["wh"] + p["bh"][0]                 # (B, S, H, num_heads)
    return res2, head


if __name__ == "__main__":
    B, S = 2, 8
    hidden, inner = 32, 64
    num_heads = 4
    d_key = d_value = hidden // num_heads
    act = "relu"

    key = jax.random.PRNGKey(0)
    kx, kp = jax.random.split(key)
    x = jax.random.normal(kx, (B, S, hidden), jnp.float32)
    # lower-triangular (causal-style) keep mask, 1 = attend, 0 = masked
    mask = jnp.tril(jnp.ones((S, S), jnp.float32))[None].repeat(B, axis=0)

    params = init_params(kp, hidden, num_heads, d_key, d_value, inner)

    fwd = jax.jit(functools.partial(
        encoder_layer, num_heads=num_heads, d_key=d_key, d_value=d_value, act=act))
    out, head = fwd(x, mask, params)
    out = jax.block_until_ready(out)
    head = jax.block_until_ready(head)

    out_ref, head_ref = reference(
        x, mask, params,
        num_heads=num_heads, d_key=d_key, d_value=d_value, act=act)
    assert out.shape == (B, S, hidden) and head.shape == (B, S, num_heads, num_heads)
    # bf16 matmul operands (f32 accumulation) => slightly looser tolerance than f32
    assert jnp.allclose(out, out_ref, rtol=2e-2, atol=2e-2)
    assert jnp.allclose(head, head_ref, rtol=2e-2, atol=2e-2)

    print("KERNEL_OK")
</pallas_src>

<mosaic_0001>
module attributes {stable_mosaic.version = 11 : i64} {
  func.func @_encoder_layer_kernel(%arg0: i32, %arg1: memref<2x8x32xf32, #tpu.memory_space<vmem>>, %arg2: memref<2x8x8xf32, #tpu.memory_space<vmem>>, %arg3: memref<4x32x8xbf16, #tpu.memory_space<vmem>>, %arg4: memref<4x1x8xf32, #tpu.memory_space<vmem>>, %arg5: memref<4x32x8xbf16, #tpu.memory_space<vmem>>, %arg6: memref<4x1x8xf32, #tpu.memory_space<vmem>>, %arg7: memref<4x32x8xbf16, #tpu.memory_space<vmem>>, %arg8: memref<4x1x8xf32, #tpu.memory_space<vmem>>, %arg9: memref<4x8x32xbf16, #tpu.memory_space<vmem>>, %arg10: memref<1x32xf32, #tpu.memory_space<vmem>>, %arg11: memref<1x32xf32, #tpu.memory_space<vmem>>, %arg12: memref<1x32xf32, #tpu.memory_space<vmem>>, %arg13: memref<32x64xbf16, #tpu.memory_space<vmem>>, %arg14: memref<1x64xf32, #tpu.memory_space<vmem>>, %arg15: memref<64x32xbf16, #tpu.memory_space<vmem>>, %arg16: memref<1x32xf32, #tpu.memory_space<vmem>>, %arg17: memref<1x32xf32, #tpu.memory_space<vmem>>, %arg18: memref<1x32xf32, #tpu.memory_space<vmem>>, %arg19: memref<8x4xbf16, #tpu.memory_space<vmem>>, %arg20: memref<1x4xf32, #tpu.memory_space<vmem>>, %arg21: memref<2x8x32xf32, #tpu.memory_space<vmem>>, %arg22: memref<2x32x4xf32, #tpu.memory_space<vmem>>) attributes {dimension_semantics = [#tpu.dimension_semantics<parallel>], iteration_bounds = array<i64: 1>, scalar_prefetch = 0 : i64, scratch_operands = 0 : i64, tpu.core_type = #tpu.core_type<tc>, window_params = [{transform_indices = @transform_0, window_bounds = array<i64: 2, 8, 32>}, {transform_indices = @transform_1, window_bounds = array<i64: 2, 8, 8>}, {pipeline_mode = #tpu.pipeline_mode<synchronous>, transform_indices = @transform_2, window_bounds = array<i64: 4, 32, 8>}, {pipeline_mode = #tpu.pipeline_mode<synchronous>, transform_indices = @transform_3, window_bounds = array<i64: 4, 1, 8>}, {pipeline_mode = #tpu.pipeline_mode<synchronous>, transform_indices = @transform_4, window_bounds = array<i64: 4, 32, 8>}, {pipeline_mode = #tpu.pipeline_mode<synchronous>, transform_indices = @transform_5, window_bounds = array<i64: 4, 1, 8>}, {pipeline_mode = #tpu.pipeline_mode<synchronous>, transform_indices = @transform_6, window_bounds = array<i64: 4, 32, 8>}, {pipeline_mode = #tpu.pipeline_mode<synchronous>, transform_indices = @transform_7, window_bounds = array<i64: 4, 1, 8>}, {pipeline_mode = #tpu.pipeline_mode<synchronous>, transform_indices = @transform_8, window_bounds = array<i64: 4, 8, 32>}, {pipeline_mode = #tpu.pipeline_mode<synchronous>, transform_indices = @transform_9, window_bounds = array<i64: 1, 32>}, {pipeline_mode = #tpu.pipeline_mode<synchronous>, transform_indices = @transform_10, window_bounds = array<i64: 1, 32>}, {pipeline_mode = #tpu.pipeline_mode<synchronous>, transform_indices = @transform_11, window_bounds = array<i64: 1, 32>}, {pipeline_mode = #tpu.pipeline_mode<synchronous>, transform_indices = @transform_12, window_bounds = array<i64: 32, 64>}, {pipeline_mode = #tpu.pipeline_mode<synchronous>, transform_indices = @transform_13, window_bounds = array<i64: 1, 64>}, {pipeline_mode = #tpu.pipeline_mode<synchronous>, transform_indices = @transform_14, window_bounds = array<i64: 64, 32>}, {pipeline_mode = #tpu.pipeline_mode<synchronous>, transform_indices = @transform_15, window_bounds = array<i64: 1, 32>}, {pipeline_mode = #tpu.pipeline_mode<synchronous>, transform_indices = @transform_16, window_bounds = array<i64: 1, 32>}, {pipeline_mode = #tpu.pipeline_mode<synchronous>, transform_indices = @transform_17, window_bounds = array<i64: 1, 32>}, {pipeline_mode = #tpu.pipeline_mode<synchronous>, transform_indices = @transform_18, window_bounds = array<i64: 8, 4>}, {pipeline_mode = #tpu.pipeline_mode<synchronous>, transform_indices = @transform_19, window_bounds = array<i64: 1, 4>}, {transform_indices = @transform_20, window_bounds = array<i64: 2, 8, 32>}, {transform_indices = @transform_21, window_bounds = array<i64: 2, 32, 4>}]} {
    %c0 = arith.constant 0 : index
    %c0_0 = arith.constant 0 : index
    %c0_1 = arith.constant 0 : index
    %0 = vector.load %arg1[%c0, %c0_0, %c0_1] : memref<2x8x32xf32, #tpu.memory_space<vmem>>, vector<2x8x32xf32>
    %1 = vector.shape_cast %0 : vector<2x8x32xf32> to vector<16x32xf32>
    %2 = arith.truncf %1 : vector<16x32xf32> to vector<16x32xbf16>
    %c0_2 = arith.constant 0 : index
    %c0_3 = arith.constant 0 : index
    %c0_4 = arith.constant 0 : index
    %3 = vector.load %arg2[%c0_2, %c0_3, %c0_4] : memref<2x8x8xf32, #tpu.memory_space<vmem>>, vector<2x8x8xf32>
    %cst = arith.constant 0.000000e+00 : f32
    %4 = vector.broadcast %cst : f32 to vector<2x8x8xf32>
    %5 = arith.cmpf oeq, %3, %4 : vector<2x8x8xf32>
    %cst_5 = arith.constant 0.000000e+00 : f32
    %6 = vector.broadcast %cst_5 : f32 to vector<16x32xf32>
    %c0_6 = arith.constant 0 : index
    %c0_7 = arith.constant 0 : index
    %c0_8 = arith.constant 0 : index
    %7 = vector.load %arg3[%c0_6, %c0_7, %c0_8] : memref<4x32x8xbf16, #tpu.memory_space<vmem>>, vector<1x32x8xbf16>
    %8 = vector.shape_cast %7 : vector<1x32x8xbf16> to vector<32x8xbf16>
    %cst_9 = arith.constant dense<0.000000e+00> : vector<16x8xf32>
    %9 = tpu.matmul %2, %8, %cst_9 {dimension_numbers = #tpu.dot_dimension_numbers<[1], [0], [0], [1], [0, 0, 1, 1], [], []>} : vector<16x32xbf16>, vector<32x8xbf16>, vector<16x8xf32> -> vector<16x8xf32>
    %c0_10 = arith.constant 0 : index
    %c0_11 = arith.constant 0 : index
    %c0_12 = arith.constant 0 : index
    %10 = vector.load %arg4[%c0_10, %c0_11, %c0_12] : memref<4x1x8xf32, #tpu.memory_space<vmem>>, vector<1x1x8xf32>
    %11 = vector.shape_cast %10 : vector<1x1x8xf32> to vector<1x8xf32>
    %12 = vector.broadcast %11 : vector<1x8xf32> to vector<16x8xf32>
    %13 = arith.addf %9, %12 : vector<16x8xf32>
    %c0_13 = arith.constant 0 : index
    %c0_14 = arith.constant 0 : index
    %c0_15 = arith.constant 0 : index
    %14 = vector.load %arg5[%c0_13, %c0_14, %c0_15] : memref<4x32x8xbf16, #tpu.memory_space<vmem>>, vector<1x32x8xbf16>
    %15 = vector.shape_cast %14 : vector<1x32x8xbf16> to vector<32x8xbf16>
    %cst_16 = arith.constant dense<0.000000e+00> : vector<16x8xf32>
    %16 = tpu.matmul %2, %15, %cst_16 {dimension_numbers = #tpu.dot_dimension_numbers<[1], [0], [0], [1], [0, 0, 1, 1], [], []>} : vector<16x32xbf16>, vector<32x8xbf16>, vector<16x8xf32> -> vector<16x8xf32>
    %c0_17 = arith.constant 0 : index
    %c0_18 = arith.constant 0 : index
    %c0_19 = arith.constant 0 : index
    %17 = vector.load %arg6[%c0_17, %c0_18, %c0_19] : memref<4x1x8xf32, #tpu.memory_space<vmem>>, vector<1x1x8xf32>
    %18 = vector.shape_cast %17 : vector<1x1x8xf32> to vector<1x8xf32>
    %19 = vector.broadcast %18 : vector<1x8xf32> to vector<16x8xf32>
    %20 = arith.addf %16, %19 : vector<16x8xf32>
    %c0_20 = arith.constant 0 : index
    %c0_21 = arith.constant 0 : index
    %c0_22 = arith.constant 0 : index
    %21 = vector.load %arg7[%c0_20, %c0_21, %c0_22] : memref<4x32x8xbf16, #tpu.memory_space<vmem>>, vector<1x32x8xbf16>
    %22 = vector.shape_cast %21 : vector<1x32x8xbf16> to vector<32x8xbf16>
    %cst_23 = arith.constant dense<0.000000e+00> : vector<16x8xf32>
    %23 = tpu.matmul %2, %22, %cst_23 {dimension_numbers = #tpu.dot_dimension_numbers<[1], [0], [0], [1], [0, 0, 1, 1], [], []>} : vector<16x32xbf16>, vector<32x8xbf16>, vector<16x8xf32> -> vector<16x8xf32>
    %c0_24 = arith.constant 0 : index
    %c0_25 = arith.constant 0 : index
    %c0_26 = arith.constant 0 : index
    %24 = vector.load %arg8[%c0_24, %c0_25, %c0_26] : memref<4x1x8xf32, #tpu.memory_space<vmem>>, vector<1x1x8xf32>
    %25 = vector.shape_cast %24 : vector<1x1x8xf32> to vector<1x8xf32>
    %26 = vector.broadcast %25 : vector<1x8xf32> to vector<16x8xf32>
    %27 = arith.addf %23, %26 : vector<16x8xf32>
    %28 = vector.shape_cast %13 : vector<16x8xf32> to vector<2x8x8xf32>
    %29 = arith.truncf %28 : vector<2x8x8xf32> to vector<2x8x8xbf16>
    %30 = vector.shape_cast %20 : vector<16x8xf32> to vector<2x8x8xf32>
    %31 = arith.truncf %30 : vector<2x8x8xf32> to vector<2x8x8xbf16>
    %32 = vector.shape_cast %27 : vector<16x8xf32> to vector<2x8x8xf32>
    %33 = arith.truncf %32 : vector<2x8x8xf32> to vector<2x8x8xbf16>
    "tpu.trace_start"() <{level = 10 : i32, message = "bqd,bkd->bqk"}> : () -> ()
    %cst_27 = arith.constant dense<0.000000e+00> : vector<2x8x8xf32>
    %34 = tpu.matmul %29, %31, %cst_27 {dimension_numbers = #tpu.dot_dimension_numbers<[2], [2], [1], [1], [0, 0, 0, 1, 1, 1], [0], [0]>} : vector<2x8x8xbf16>, vector<2x8x8xbf16>, vector<2x8x8xf32> -> vector<2x8x8xf32>
    "tpu.trace_stop"() : () -> ()
    %cst_28 = arith.constant 0.353553385 : f32
    %35 = vector.broadcast %cst_28 : f32 to vector<2x8x8xf32>
    %36 = arith.mulf %34, %35 : vector<2x8x8xf32>
    %cst_29 = arith.constant -1.000000e+09 : f32
    %37 = vector.broadcast %cst_29 : f32 to vector<2x8x8xf32>
    %38 = arith.select %5, %37, %36 : vector<2x8x8xi1>, vector<2x8x8xf32>
    %cst_30 = arith.constant dense<0xFF800000> : vector<2x8xf32>
    %39 = vector.multi_reduction <maximumf>, %38, %cst_30 [2] : vector<2x8x8xf32> to vector<2x8xf32>
    %40 = vector.shape_cast %39 : vector<2x8xf32> to vector<2x8x1xf32>
    %41 = vector.broadcast %40 : vector<2x8x1xf32> to vector<2x8x8xf32>
    %42 = arith.subf %38, %41 : vector<2x8x8xf32>
    %43 = math.exp %42 : vector<2x8x8xf32>
    %cst_31 = arith.constant dense<0.000000e+00> : vector<2x8xf32>
    %44 = vector.multi_reduction <add>, %43, %cst_31 [2] : vector<2x8x8xf32> to vector<2x8xf32>
    %45 = vector.shape_cast %44 : vector<2x8xf32> to vector<2x8x1xf32>
    %46 = tpu.reciprocal %45 {approx = true} : vector<2x8x1xf32> -> vector<2x8x1xf32>
    %47 = vector.broadcast %46 : vector<2x8x1xf32> to vector<2x8x8xf32>
    %48 = arith.mulf %43, %47 : vector<2x8x8xf32>
    %49 = arith.truncf %48 : vector<2x8x8xf32> to vector<2x8x8xbf16>
    "tpu.trace_start"() <{level = 10 : i32, message = "bqk,bkd->bqd"}> : () -> ()
    %cst_32 = arith.constant dense<0.000000e+00> : vector<2x8x8xf32>
    %50 = tpu.matmul %49, %33, %cst_32 {dimension_numbers = #tpu.dot_dimension_numbers<[2], [1], [1], [2], [0, 0, 0, 1, 1, 2], [0], [0]>} : vector<2x8x8xbf16>, vector<2x8x8xbf16>, vector<2x8x8xf32> -> vector<2x8x8xf32>
    "tpu.trace_stop"() : () -> ()
    %51 = vector.shape_cast %50 : vector<2x8x8xf32> to vector<16x8xf32>
    %52 = arith.truncf %51 : vector<16x8xf32> to vector<16x8xbf16>
    %c0_33 = arith.constant 0 : index
    %c0_34 = arith.constant 0 : index
    %c0_35 = arith.constant 0 : index
    %53 = vector.load %arg9[%c0_33, %c0_34, %c0_35] : memref<4x8x32xbf16, #tpu.memory_space<vmem>>, vector<1x8x32xbf16>
    %54 = vector.shape_cast %53 : vector<1x8x32xbf16> to vector<8x32xbf16>
    %cst_36 = arith.constant dense<0.000000e+00> : vector<16x32xf32>
    %55 = tpu.matmul %52, %54, %cst_36 {dimension_numbers = #tpu.dot_dimension_numbers<[1], [0], [0], [1], [0, 0, 1, 1], [], []>} : vector<16x8xbf16>, vector<8x32xbf16>, vector<16x32xf32> -> vector<16x32xf32>
    %56 = arith.addf %6, %55 : vector<16x32xf32>
    %c1 = arith.constant 1 : index
    %c0_37 = arith.constant 0 : index
    %c0_38 = arith.constant 0 : index
    %57 = vector.load %arg3[%c1, %c0_37, %c0_38] : memref<4x32x8xbf16, #tpu.memory_space<vmem>>, vector<1x32x8xbf16>
    %58 = vector.shape_cast %57 : vector<1x32x8xbf16> to vector<32x8xbf16>
    %cst_39 = arith.constant dense<0.000000e+00> : vector<16x8xf32>
    %59 = tpu.matmul %2, %58, %cst_39 {dimension_numbers = #tpu.dot_dimension_numbers<[1], [0], [0], [1], [0, 0, 1, 1], [], []>} : vector<16x32xbf16>, vector<32x8xbf16>, vector<16x8xf32> -> vector<16x8xf32>
    %c1_40 = arith.constant 1 : index
    %c0_41 = arith.constant 0 : index
    %c0_42 = arith.constant 0 : index
    %60 = vector.load %arg4[%c1_40, %c0_41, %c0_42] : memref<4x1x8xf32, #tpu.memory_space<vmem>>, vector<1x1x8xf32>
    %61 = vector.shape_cast %60 : vector<1x1x8xf32> to vector<1x8xf32>
    %62 = vector.broadcast %61 : vector<1x8xf32> to vector<16x8xf32>
    %63 = arith.addf %59, %62 : vector<16x8xf32>
    %c1_43 = arith.constant 1 : index
    %c0_44 = arith.constant 0 : index
    %c0_45 = arith.constant 0 : index
    %64 = vector.load %arg5[%c1_43, %c0_44, %c0_45] : memref<4x32x8xbf16, #tpu.memory_space<vmem>>, vector<1x32x8xbf16>
    %65 = vector.shape_cast %64 : vector<1x32x8xbf16> to vector<32x8xbf16>
    %cst_46 = arith.constant dense<0.000000e+00> : vector<16x8xf32>
    %66 = tpu.matmul %2, %65, %cst_46 {dimension_numbers = #tpu.dot_dimension_numbers<[1], [0], [0], [1], [0, 0, 1, 1], [], []>} : vector<16x32xbf16>, vector<32x8xbf16>, vector<16x8xf32> -> vector<16x8xf32>
    %c1_47 = arith.constant 1 : index
    %c0_48 = arith.constant 0 : index
    %c0_49 = arith.constant 0 : index
    %67 = vector.load %arg6[%c1_47, %c0_48, %c0_49] : memref<4x1x8xf32, #tpu.memory_space<vmem>>, vector<1x1x8xf32>
    %68 = vector.shape_cast %67 : vector<1x1x8xf32> to vector<1x8xf32>
    %69 = vector.broadcast %68 : vector<1x8xf32> to vector<16x8xf32>
    %70 = arith.addf %66, %69 : vector<16x8xf32>
    %c1_50 = arith.constant 1 : index
    %c0_51 = arith.constant 0 : index
    %c0_52 = arith.constant 0 : index
    %71 = vector.load %arg7[%c1_50, %c0_51, %c0_52] : memref<4x32x8xbf16, #tpu.memory_space<vmem>>, vector<1x32x8xbf16>
    %72 = vector.shape_cast %71 : vector<1x32x8xbf16> to vector<32x8xbf16>
    %cst_53 = arith.constant dense<0.000000e+00> : vector<16x8xf32>
    %73 = tpu.matmul %2, %72, %cst_53 {dimension_numbers = #tpu.dot_dimension_numbers<[1], [0], [0], [1], [0, 0, 1, 1], [], []>} : vector<16x32xbf16>, vector<32x8xbf16>, vector<16x8xf32> -> vector<16x8xf32>
    %c1_54 = arith.constant 1 : index
    %c0_55 = arith.constant 0 : index
    %c0_56 = arith.constant 0 : index
    %74 = vector.load %arg8[%c1_54, %c0_55, %c0_56] : memref<4x1x8xf32, #tpu.memory_space<vmem>>, vector<1x1x8xf32>
    %75 = vector.shape_cast %74 : vector<1x1x8xf32> to vector<1x8xf32>
    %76 = vector.broadcast %75 : vector<1x8xf32> to vector<16x8xf32>
    %77 = arith.addf %73, %76 : vector<16x8xf32>
    %78 = vector.shape_cast %63 : vector<16x8xf32> to vector<2x8x8xf32>
    %79 = arith.truncf %78 : vector<2x8x8xf32> to vector<2x8x8xbf16>
    %80 = vector.shape_cast %70 : vector<16x8xf32> to vector<2x8x8xf32>
    %81 = arith.truncf %80 : vector<2x8x8xf32> to vector<2x8x8xbf16>
    %82 = vector.shape_cast %77 : vector<16x8xf32> to vector<2x8x8xf32>
    %83 = arith.truncf %82 : vector<2x8x8xf32> to vector<2x8x8xbf16>
    "tpu.trace_start"() <{level = 10 : i32, message = "bqd,bkd->bqk"}> : () -> ()
    %cst_57 = arith.constant dense<0.000000e+00> : vector<2x8x8xf32>
    %84 = tpu.matmul %79, %81, %cst_57 {dimension_numbers = #tpu.dot_dimension_numbers<[2], [2], [1], [1], [0, 0, 0, 1, 1, 1], [0], [0]>} : vector<2x8x8xbf16>, vector<2x8x8xbf16>, vector<2x8x8xf32> -> vector<2x8x8xf32>
    "tpu.trace_stop"() : () -> ()
    %cst_58 = arith.constant 0.353553385 : f32
    %85 = vector.broadcast %cst_58 : f32 to vector<2x8x8xf32>
    %86 = arith.mulf %84, %85 : vector<2x8x8xf32>
    %cst_59 = arith.constant -1.000000e+09 : f32
    %87 = vector.broadcast %cst_59 : f32 to vector<2x8x8xf32>
    %88 = arith.select %5, %87, %86 : vector<2x8x8xi1>, vector<2x8x8xf32>
    %cst_60 = arith.constant dense<0xFF800000> : vector<2x8xf32>
    %89 = vector.multi_reduction <maximumf>, %88, %cst_60 [2] : vector<2x8x8xf32> to vector<2x8xf32>
    %90 = vector.shape_cast %89 : vector<2x8xf32> to vector<2x8x1xf32>
    %91 = vector.broadcast %90 : vector<2x8x1xf32> to vector<2x8x8xf32>
    %92 = arith.subf %88, %91 : vector<2x8x8xf32>
    %93 = math.exp %92 : vector<2x8x8xf32>
    %cst_61 = arith.constant dense<0.000000e+00> : vector<2x8xf32>
    %94 = vector.multi_reduction <add>, %93, %cst_61 [2] : vector<2x8x8xf32> to vector<2x8xf32>
    %95 = vector.shape_cast %94 : vector<2x8xf32> to vector<2x8x1xf32>
    %96 = tpu.reciprocal %95 {approx = true} : vector<2x8x1xf32> -> vector<2x8x1xf32>
    %97 = vector.broadcast %96 : vector<2x8x1xf32> to vector<2x8x8xf32>
    %98 = arith.mulf %93, %97 : vector<2x8x8xf32>
    %99 = arith.truncf %98 : vector<2x8x8xf32> to vector<2x8x8xbf16>
    "tpu.trace_start"() <{level = 10 : i32, message = "bqk,bkd->bqd"}> : () -> ()
    %cst_62 = arith.constant dense<0.000000e+00> : vector<2x8x8xf32>
    %100 = tpu.matmul %99, %83, %cst_62 {dimension_numbers = #tpu.dot_dimension_numbers<[2], [1], [1], [2], [0, 0, 0, 1, 1, 2], [0], [0]>} : vector<2x8x8xbf16>, vector<2x8x8xbf16>, vector<2x8x8xf32> -> vector<2x8x8xf32>
    "tpu.trace_stop"() : () -> ()
    %101 = vector.shape_cast %100 : vector<2x8x8xf32> to vector<16x8xf32>
    %102 = arith.truncf %101 : vector<16x8xf32> to vector<16x8xbf16>
    %c1_63 = arith.constant 1 : index
    %c0_64 = arith.constant 0 : index
    %c0_65 = arith.constant 0 : index
    %103 = vector.load %arg9[%c1_63, %c0_64, %c0_65] : memref<4x8x32xbf16, #tpu.memory_space<vmem>>, vector<1x8x32xbf16>
    %104 = vector.shape_cast %103 : vector<1x8x32xbf16> to vector<8x32xbf16>
    %cst_66 = arith.constant dense<0.000000e+00> : vector<16x32xf32>
    %105 = tpu.matmul %102, %104, %cst_66 {dimension_numbers = #tpu.dot_dimension_numbers<[1], [0], [0], [1], [0, 0, 1, 1], [], []>} : vector<16x8xbf16>, vector<8x32xbf16>, vector<16x32xf32> -> vector<16x32xf32>
    %106 = arith.addf %56, %105 : vector<16x32xf32>
    %c2 = arith.constant 2 : index
    %c0_67 = arith.constant 0 : index
    %c0_68 = arith.constant 0 : index
    %107 = vector.load %arg3[%c2, %c0_67, %c0_68] : memref<4x32x8xbf16, #tpu.memory_space<vmem>>, vector<1x32x8xbf16>
    %108 = vector.shape_cast %107 : vector<1x32x8xbf16> to vector<32x8xbf16>
    %cst_69 = arith.constant dense<0.000000e+00> : vector<16x8xf32>
    %109 = tpu.matmul %2, %108, %cst_69 {dimension_numbers = #tpu.dot_dimension_numbers<[1], [0], [0], [1], [0, 0, 1, 1], [], []>} : vector<16x32xbf16>, vector<32x8xbf16>, vector<16x8xf32> -> vector<16x8xf32>
    %c2_70 = arith.constant 2 : index
    %c0_71 = arith.constant 0 : index
    %c0_72 = arith.constant 0 : index
    %110 = vector.load %arg4[%c2_70, %c0_71, %c0_72] : memref<4x1x8xf32, #tpu.memory_space<vmem>>, vector<1x1x8xf32>
    %111 = vector.shape_cast %110 : vector<1x1x8xf32> to vector<1x8xf32>
    %112 = vector.broadcast %111 : vector<1x8xf32> to vector<16x8xf32>
    %113 = arith.addf %109, %112 : vector<16x8xf32>
    %c2_73 = arith.constant 2 : index
    %c0_74 = arith.constant 0 : index
    %c0_75 = arith.constant 0 : index
    %114 = vector.load %arg5[%c2_73, %c0_74, %c0_75] : memref<4x32x8xbf16, #tpu.memory_space<vmem>>, vector<1x32x8xbf16>
    %115 = vector.shape_cast %114 : vector<1x32x8xbf16> to vector<32x8xbf16>
    %cst_76 = arith.constant dense<0.000000e+00> : vector<16x8xf32>
    %116 = tpu.matmul %2, %115, %cst_76 {dimension_numbers = #tpu.dot_dimension_numbers<[1], [0], [0], [1], [0, 0, 1, 1], [], []>} : vector<16x32xbf16>, vector<32x8xbf16>, vector<16x8xf32> -> vector<16x8xf32>
    %c2_77 = arith.constant 2 : index
    %c0_78 = arith.constant 0 : index
    %c0_79 = arith.constant 0 : index
    %117 = vector.load %arg6[%c2_77, %c0_78, %c0_79] : memref<4x1x8xf32, #tpu.memory_space<vmem>>, vector<1x1x8xf32>
    %118 = vector.shape_cast %117 : vector<1x1x8xf32> to vector<1x8xf32>
    %119 = vector.broadcast %118 : vector<1x8xf32> to vector<16x8xf32>
    %120 = arith.addf %116, %119 : vector<16x8xf32>
    %c2_80 = arith.constant 2 : index
    %c0_81 = arith.constant 0 : index
    %c0_82 = arith.constant 0 : index
    %121 = vector.load %arg7[%c2_80, %c0_81, %c0_82] : memref<4x32x8xbf16, #tpu.memory_space<vmem>>, vector<1x32x8xbf16>
    %122 = vector.shape_cast %121 : vector<1x32x8xbf16> to vector<32x8xbf16>
    %cst_83 = arith.constant dense<0.000000e+00> : vector<16x8xf32>
    %123 = tpu.matmul %2, %122, %cst_83 {dimension_numbers = #tpu.dot_dimension_numbers<[1], [0], [0], [1], [0, 0, 1, 1], [], []>} : vector<16x32xbf16>, vector<32x8xbf16>, vector<16x8xf32> -> vector<16x8xf32>
    %c2_84 = arith.constant 2 : index
    %c0_85 = arith.constant 0 : index
    %c0_86 = arith.constant 0 : index
    %124 = vector.load %arg8[%c2_84, %c0_85, %c0_86] : memref<4x1x8xf32, #tpu.memory_space<vmem>>, vector<1x1x8xf32>
    %125 = vector.shape_cast %124 : vector<1x1x8xf32> to vector<1x8xf32>
    %126 = vector.broadcast %125 : vector<1x8xf32> to vector<16x8xf32>
    %127 = arith.addf %123, %126 : vector<16x8xf32>
    %128 = vector.shape_cast %113 : vector<16x8xf32> to vector<2x8x8xf32>
    %129 = arith.truncf %128 : vector<2x8x8xf32> to vector<2x8x8xbf16>
    %130 = vector.shape_cast %120 : vector<16x8xf32> to vector<2x8x8xf32>
    %131 = arith.truncf %130 : vector<2x8x8xf32> to vector<2x8x8xbf16>
    %132 = vector.shape_cast %127 : vector<16x8xf32> to vector<2x8x8xf32>
    %133 = arith.truncf %132 : vector<2x8x8xf32> to vector<2x8x8xbf16>
    "tpu.trace_start"() <{level = 10 : i32, message = "bqd,bkd->bqk"}> : () -> ()
    %cst_87 = arith.constant dense<0.000000e+00> : vector<2x8x8xf32>
    %134 = tpu.matmul %129, %131, %cst_87 {dimension_numbers = #tpu.dot_dimension_numbers<[2], [2], [1], [1], [0, 0, 0, 1, 1, 1], [0], [0]>} : vector<2x8x8xbf16>, vector<2x8x8xbf16>, vector<2x8x8xf32> -> vector<2x8x8xf32>
    "tpu.trace_stop"() : () -> ()
    %cst_88 = arith.constant 0.353553385 : f32
    %135 = vector.broadcast %cst_88 : f32 to vector<2x8x8xf32>
    %136 = arith.mulf %134, %135 : vector<2x8x8xf32>
    %cst_89 = arith.constant -1.000000e+09 : f32
    %137 = vector.broadcast %cst_89 : f32 to vector<2x8x8xf32>
    %138 = arith.select %5, %137, %136 : vector<2x8x8xi1>, vector<2x8x8xf32>
    %cst_90 = arith.constant dense<0xFF800000> : vector<2x8xf32>
    %139 = vector.multi_reduction <maximumf>, %138, %cst_90 [2] : vector<2x8x8xf32> to vector<2x8xf32>
    %140 = vector.shape_cast %139 : vector<2x8xf32> to vector<2x8x1xf32>
    %141 = vector.broadcast %140 : vector<2x8x1xf32> to vector<2x8x8xf32>
    %142 = arith.subf %138, %141 : vector<2x8x8xf32>
    %143 = math.exp %142 : vector<2x8x8xf32>
    %cst_91 = arith.constant dense<0.000000e+00> : vector<2x8xf32>
    %144 = vector.multi_reduction <add>, %143, %cst_91 [2] : vector<2x8x8xf32> to vector<2x8xf32>
    %145 = vector.shape_cast %144 : vector<2x8xf32> to vector<2x8x1xf32>
    %146 = tpu.reciprocal %145 {approx = true} : vector<2x8x1xf32> -> vector<2x8x1xf32>
    %147 = vector.broadcast %146 : vector<2x8x1xf32> to vector<2x8x8xf32>
    %148 = arith.mulf %143, %147 : vector<2x8x8xf32>
    %149 = arith.truncf %148 : vector<2x8x8xf32> to vector<2x8x8xbf16>
    "tpu.trace_start"() <{level = 10 : i32, message = "bqk,bkd->bqd"}> : () -> ()
    %cst_92 = arith.constant dense<0.000000e+00> : vector<2x8x8xf32>
    %150 = tpu.matmul %149, %133, %cst_92 {dimension_numbers = #tpu.dot_dimension_numbers<[2], [1], [1], [2], [0, 0, 0, 1, 1, 2], [0], [0]>} : vector<2x8x8xbf16>, vector<2x8x8xbf16>, vector<2x8x8xf32> -> vector<2x8x8xf32>
    "tpu.trace_stop"() : () -> ()
    %151 = vector.shape_cast %150 : vector<2x8x8xf32> to vector<16x8xf32>
    %152 = arith.truncf %151 : vector<16x8xf32> to vector<16x8xbf16>
    %c2_93 = arith.constant 2 : index
    %c0_94 = arith.constant 0 : index
    %c0_95 = arith.constant 0 : index
    %153 = vector.load %arg9[%c2_93, %c0_94, %c0_95] : memref<4x8x32xbf16, #tpu.memory_space<vmem>>, vector<1x8x32xbf16>
    %154 = vector.shape_cast %153 : vector<1x8x32xbf16> to vector<8x32xbf16>
    %cst_96 = arith.constant dense<0.000000e+00> : vector<16x32xf32>
    %155 = tpu.matmul %152, %154, %cst_96 {dimension_numbers = #tpu.dot_dimension_numbers<[1], [0], [0], [1], [0, 0, 1, 1], [], []>} : vector<16x8xbf16>, vector<8x32xbf16>, vector<16x32xf32> -> vector<16x32xf32>
    %156 = arith.addf %106, %155 : vector<16x32xf32>
    %c3 = arith.constant 3 : index
    %c0_97 = arith.constant 0 : index
    %c0_98 = arith.constant 0 : index
    %157 = vector.load %arg3[%c3, %c0_97, %c0_98] : memref<4x32x8xbf16, #tpu.memory_space<vmem>>, vector<1x32x8xbf16>
    %158 = vector.shape_cast %157 : vector<1x32x8xbf16> to vector<32x8xbf16>
    %cst_99 = arith.constant dense<0.000000e+00> : vector<16x8xf32>
    %159 = tpu.matmul %2, %158, %cst_99 {dimension_numbers = #tpu.dot_dimension_numbers<[1], [0], [0], [1], [0, 0, 1, 1], [], []>} : vector<16x32xbf16>, vector<32x8xbf16>, vector<16x8xf32> -> vector<16x8xf32>
    %c3_100 = arith.constant 3 : index
    %c0_101 = arith.constant 0 : index
    %c0_102 = arith.constant 0 : index
    %160 = vector.load %arg4[%c3_100, %c0_101, %c0_102] : memref<4x1x8xf32, #tpu.memory_space<vmem>>, vector<1x1x8xf32>
    %161 = vector.shape_cast %160 : vector<1x1x8xf32> to vector<1x8xf32>
    %162 = vector.broadcast %161 : vector<1x8xf32> to vector<16x8xf32>
    %163 = arith.addf %159, %162 : vector<16x8xf32>
    %c3_103 = arith.constant 3 : index
    %c0_104 = arith.constant 0 : index
    %c0_105 = arith.constant 0 : index
    %164 = vector.load %arg5[%c3_103, %c0_104, %c0_105] : memref<4x32x8xbf16, #tpu.memory_space<vmem>>, vector<1x32x8xbf16>
    %165 = vector.shape_cast %164 : vector<1x32x8xbf16> to vector<32x8xbf16>
    %cst_106 = arith.constant dense<0.000000e+00> : vector<16x8xf32>
    %166 = tpu.matmul %2, %165, %cst_106 {dimension_numbers = #tpu.dot_dimension_numbers<[1], [0], [0], [1], [0, 0, 1, 1], [], []>} : vector<16x32xbf16>, vector<32x8xbf16>, vector<16x8xf32> -> vector<16x8xf32>
    %c3_107 = arith.constant 3 : index
    %c0_108 = arith.constant 0 : index
    %c0_109 = arith.constant 0 : index
    %167 = vector.load %arg6[%c3_107, %c0_108, %c0_109] : memref<4x1x8xf32, #tpu.memory_space<vmem>>, vector<1x1x8xf32>
    %168 = vector.shape_cast %167 : vector<1x1x8xf32> to vector<1x8xf32>
    %169 = vector.broadcast %168 : vector<1x8xf32> to vector<16x8xf32>
    %170 = arith.addf %166, %169 : vector<16x8xf32>
    %c3_110 = arith.constant 3 : index
    %c0_111 = arith.constant 0 : index
    %c0_112 = arith.constant 0 : index
    %171 = vector.load %arg7[%c3_110, %c0_111, %c0_112] : memref<4x32x8xbf16, #tpu.memory_space<vmem>>, vector<1x32x8xbf16>
    %172 = vector.shape_cast %171 : vector<1x32x8xbf16> to vector<32x8xbf16>
    %cst_113 = arith.constant dense<0.000000e+00> : vector<16x8xf32>
    %173 = tpu.matmul %2, %172, %cst_113 {dimension_numbers = #tpu.dot_dimension_numbers<[1], [0], [0], [1], [0, 0, 1, 1], [], []>} : vector<16x32xbf16>, vector<32x8xbf16>, vector<16x8xf32> -> vector<16x8xf32>
    %c3_114 = arith.constant 3 : index
    %c0_115 = arith.constant 0 : index
    %c0_116 = arith.constant 0 : index
    %174 = vector.load %arg8[%c3_114, %c0_115, %c0_116] : memref<4x1x8xf32, #tpu.memory_space<vmem>>, vector<1x1x8xf32>
    %175 = vector.shape_cast %174 : vector<1x1x8xf32> to vector<1x8xf32>
    %176 = vector.broadcast %175 : vector<1x8xf32> to vector<16x8xf32>
    %177 = arith.addf %173, %176 : vector<16x8xf32>
    %178 = vector.shape_cast %163 : vector<16x8xf32> to vector<2x8x8xf32>
    %179 = arith.truncf %178 : vector<2x8x8xf32> to vector<2x8x8xbf16>
    %180 = vector.shape_cast %170 : vector<16x8xf32> to vector<2x8x8xf32>
    %181 = arith.truncf %180 : vector<2x8x8xf32> to vector<2x8x8xbf16>
    %182 = vector.shape_cast %177 : vector<16x8xf32> to vector<2x8x8xf32>
    %183 = arith.truncf %182 : vector<2x8x8xf32> to vector<2x8x8xbf16>
    "tpu.trace_start"() <{level = 10 : i32, message = "bqd,bkd->bqk"}> : () -> ()
    %cst_117 = arith.constant dense<0.000000e+00> : vector<2x8x8xf32>
    %184 = tpu.matmul %179, %181, %cst_117 {dimension_numbers = #tpu.dot_dimension_numbers<[2], [2], [1], [1], [0, 0, 0, 1, 1, 1], [0], [0]>} : vector<2x8x8xbf16>, vector<2x8x8xbf16>, vector<2x8x8xf32> -> vector<2x8x8xf32>
    "tpu.trace_stop"() : () -> ()
    %cst_118 = arith.constant 0.353553385 : f32
    %185 = vector.broadcast %cst_118 : f32 to vector<2x8x8xf32>
    %186 = arith.mulf %184, %185 : vector<2x8x8xf32>
    %cst_119 = arith.constant -1.000000e+09 : f32
    %187 = vector.broadcast %cst_119 : f32 to vector<2x8x8xf32>
    %188 = arith.select %5, %187, %186 : vector<2x8x8xi1>, vector<2x8x8xf32>
    %cst_120 = arith.constant dense<0xFF800000> : vector<2x8xf32>
    %189 = vector.multi_reduction <maximumf>, %188, %cst_120 [2] : vector<2x8x8xf32> to vector<2x8xf32>
    %190 = vector.shape_cast %189 : vector<2x8xf32> to vector<2x8x1xf32>
    %191 = vector.broadcast %190 : vector<2x8x1xf32> to vector<2x8x8xf32>
    %192 = arith.subf %188, %191 : vector<2x8x8xf32>
    %193 = math.exp %192 : vector<2x8x8xf32>
    %cst_121 = arith.constant dense<0.000000e+00> : vector<2x8xf32>
    %194 = vector.multi_reduction <add>, %193, %cst_121 [2] : vector<2x8x8xf32> to vector<2x8xf32>
    %195 = vector.shape_cast %194 : vector<2x8xf32> to vector<2x8x1xf32>
    %196 = tpu.reciprocal %195 {approx = true} : vector<2x8x1xf32> -> vector<2x8x1xf32>
    %197 = vector.broadcast %196 : vector<2x8x1xf32> to vector<2x8x8xf32>
    %198 = arith.mulf %193, %197 : vector<2x8x8xf32>
    %199 = arith.truncf %198 : vector<2x8x8xf32> to vector<2x8x8xbf16>
    "tpu.trace_start"() <{level = 10 : i32, message = "bqk,bkd->bqd"}> : () -> ()
    %cst_122 = arith.constant dense<0.000000e+00> : vector<2x8x8xf32>
    %200 = tpu.matmul %199, %183, %cst_122 {dimension_numbers = #tpu.dot_dimension_numbers<[2], [1], [1], [2], [0, 0, 0, 1, 1, 2], [0], [0]>} : vector<2x8x8xbf16>, vector<2x8x8xbf16>, vector<2x8x8xf32> -> vector<2x8x8xf32>
    "tpu.trace_stop"() : () -> ()
    %201 = vector.shape_cast %200 : vector<2x8x8xf32> to vector<16x8xf32>
    %202 = arith.truncf %201 : vector<16x8xf32> to vector<16x8xbf16>
    %c3_123 = arith.constant 3 : index
    %c0_124 = arith.constant 0 : index
    %c0_125 = arith.constant 0 : index
    %203 = vector.load %arg9[%c3_123, %c0_124, %c0_125] : memref<4x8x32xbf16, #tpu.memory_space<vmem>>, vector<1x8x32xbf16>
    %204 = vector.shape_cast %203 : vector<1x8x32xbf16> to vector<8x32xbf16>
    %cst_126 = arith.constant dense<0.000000e+00> : vector<16x32xf32>
    %205 = tpu.matmul %202, %204, %cst_126 {dimension_numbers = #tpu.dot_dimension_numbers<[1], [0], [0], [1], [0, 0, 1, 1], [], []>} : vector<16x8xbf16>, vector<8x32xbf16>, vector<16x32xf32> -> vector<16x32xf32>
    %206 = arith.addf %156, %205 : vector<16x32xf32>
    %c0_127 = arith.constant 0 : index
    %c0_128 = arith.constant 0 : index
    %207 = vector.load %arg10[%c0_127, %c0_128] : memref<1x32xf32, #tpu.memory_space<vmem>>, vector<1x32xf32>
    %208 = vector.broadcast %207 : vector<1x32xf32> to vector<16x32xf32>
    %209 = arith.addf %206, %208 : vector<16x32xf32>
    %210 = arith.addf %209, %1 : vector<16x32xf32>
    %cst_129 = arith.constant dense<0.000000e+00> : vector<16xf32>
    %211 = vector.multi_reduction <add>, %210, %cst_129 [1] : vector<16x32xf32> to vector<16xf32>
    %212 = vector.shape_cast %211 : vector<16xf32> to vector<16x1xf32>
    %cst_130 = arith.constant 3.200000e+01 : f32
    %213 = vector.broadcast %cst_130 : f32 to vector<16x1xf32>
    %214 = arith.divf %212, %213 : vector<16x1xf32>
    %215 = vector.broadcast %214 : vector<16x1xf32> to vector<16x32xf32>
    %216 = arith.subf %210, %215 : vector<16x32xf32>
    %217 = arith.mulf %216, %216 : vector<16x32xf32>
    %cst_131 = arith.constant dense<0.000000e+00> : vector<16xf32>
    %218 = vector.multi_reduction <add>, %217, %cst_131 [1] : vector<16x32xf32> to vector<16xf32>
    %219 = vector.shape_cast %218 : vector<16xf32> to vector<16x1xf32>
    %cst_132 = arith.constant 3.200000e+01 : f32
    %220 = vector.broadcast %cst_132 : f32 to vector<16x1xf32>
    %221 = arith.divf %219, %220 : vector<16x1xf32>
    %222 = vector.broadcast %214 : vector<16x1xf32> to vector<16x32xf32>
    %223 = arith.subf %210, %222 : vector<16x32xf32>
    %cst_133 = arith.constant 9.99999974E-6 : f32
    %224 = vector.broadcast %cst_133 : f32 to vector<16x1xf32>
    %225 = arith.addf %221, %224 : vector<16x1xf32>
    %226 = math.rsqrt %225 : vector<16x1xf32>
    %227 = vector.broadcast %226 : vector<16x1xf32> to vector<16x32xf32>
    %228 = arith.mulf %223, %227 : vector<16x32xf32>
    %c0_134 = arith.constant 0 : index
    %c0_135 = arith.constant 0 : index
    %229 = vector.load %arg11[%c0_134, %c0_135] : memref<1x32xf32, #tpu.memory_space<vmem>>, vector<1x32xf32>
    %230 = vector.broadcast %229 : vector<1x32xf32> to vector<16x32xf32>
    %231 = arith.mulf %228, %230 : vector<16x32xf32>
    %c0_136 = arith.constant 0 : index
    %c0_137 = arith.constant 0 : index
    %232 = vector.load %arg12[%c0_136, %c0_137] : memref<1x32xf32, #tpu.memory_space<vmem>>, vector<1x32xf32>
    %233 = vector.broadcast %232 : vector<1x32xf32> to vector<16x32xf32>
    %234 = arith.addf %231, %233 : vector<16x32xf32>
    %235 = arith.truncf %234 : vector<16x32xf32> to vector<16x32xbf16>
    %c0_138 = arith.constant 0 : index
    %c0_139 = arith.constant 0 : index
    %236 = vector.load %arg13[%c0_138, %c0_139] : memref<32x64xbf16, #tpu.memory_space<vmem>>, vector<32x64xbf16>
    %cst_140 = arith.constant dense<0.000000e+00> : vector<16x64xf32>
    %237 = tpu.matmul %235, %236, %cst_140 {dimension_numbers = #tpu.dot_dimension_numbers<[1], [0], [0], [1], [0, 0, 1, 1], [], []>} : vector<16x32xbf16>, vector<32x64xbf16>, vector<16x64xf32> -> vector<16x64xf32>
    %c0_141 = arith.constant 0 : index
    %c0_142 = arith.constant 0 : index
    %238 = vector.load %arg14[%c0_141, %c0_142] : memref<1x64xf32, #tpu.memory_space<vmem>>, vector<1x64xf32>
    %239 = vector.broadcast %238 : vector<1x64xf32> to vector<16x64xf32>
    %240 = arith.addf %237, %239 : vector<16x64xf32>
    %cst_143 = arith.constant 0.000000e+00 : f32
    %241 = vector.broadcast %cst_143 : f32 to vector<16x64xf32>
    %242 = arith.maximumf %240, %241 : vector<16x64xf32>
    %243 = arith.truncf %242 : vector<16x64xf32> to vector<16x64xbf16>
    %c0_144 = arith.constant 0 : index
    %c0_145 = arith.constant 0 : index
    %244 = vector.load %arg15[%c0_144, %c0_145] : memref<64x32xbf16, #tpu.memory_space<vmem>>, vector<64x32xbf16>
    %cst_146 = arith.constant dense<0.000000e+00> : vector<16x32xf32>
    %245 = tpu.matmul %243, %244, %cst_146 {dimension_numbers = #tpu.dot_dimension_numbers<[1], [0], [0], [1], [0, 0, 1, 1], [], []>} : vector<16x64xbf16>, vector<64x32xbf16>, vector<16x32xf32> -> vector<16x32xf32>
    %c0_147 = arith.constant 0 : index
    %c0_148 = arith.constant 0 : index
    %246 = vector.load %arg16[%c0_147, %c0_148] : memref<1x32xf32, #tpu.memory_space<vmem>>, vector<1x32xf32>
    %247 = vector.broadcast %246 : vector<1x32xf32> to vector<16x32xf32>
    %248 = arith.addf %245, %247 : vector<16x32xf32>
    %249 = arith.addf %248, %234 : vector<16x32xf32>
    %cst_149 = arith.constant dense<0.000000e+00> : vector<16xf32>
    %250 = vector.multi_reduction <add>, %249, %cst_149 [1] : vector<16x32xf32> to vector<16xf32>
    %251 = vector.shape_cast %250 : vector<16xf32> to vector<16x1xf32>
    %cst_150 = arith.constant 3.200000e+01 : f32
    %252 = vector.broadcast %cst_150 : f32 to vector<16x1xf32>
    %253 = arith.divf %251, %252 : vector<16x1xf32>
    %254 = vector.broadcast %253 : vector<16x1xf32> to vector<16x32xf32>
    %255 = arith.subf %249, %254 : vector<16x32xf32>
    %256 = arith.mulf %255, %255 : vector<16x32xf32>
    %cst_151 = arith.constant dense<0.000000e+00> : vector<16xf32>
    %257 = vector.multi_reduction <add>, %256, %cst_151 [1] : vector<16x32xf32> to vector<16xf32>
    %258 = vector.shape_cast %257 : vector<16xf32> to vector<16x1xf32>
    %cst_152 = arith.constant 3.200000e+01 : f32
    %259 = vector.broadcast %cst_152 : f32 to vector<16x1xf32>
    %260 = arith.divf %258, %259 : vector<16x1xf32>
    %261 = vector.broadcast %253 : vector<16x1xf32> to vector<16x32xf32>
    %262 = arith.subf %249, %261 : vector<16x32xf32>
    %cst_153 = arith.constant 9.99999974E-6 : f32
    %263 = vector.broadcast %cst_153 : f32 to vector<16x1xf32>
    %264 = arith.addf %260, %263 : vector<16x1xf32>
    %265 = math.rsqrt %264 : vector<16x1xf32>
    %266 = vector.broadcast %265 : vector<16x1xf32> to vector<16x32xf32>
    %267 = arith.mulf %262, %266 : vector<16x32xf32>
    %c0_154 = arith.constant 0 : index
    %c0_155 = arith.constant 0 : index
    %268 = vector.load %arg17[%c0_154, %c0_155] : memref<1x32xf32, #tpu.memory_space<vmem>>, vector<1x32xf32>
    %269 = vector.broadcast %268 : vector<1x32xf32> to vector<16x32xf32>
    %270 = arith.mulf %267, %269 : vector<16x32xf32>
    %c0_156 = arith.constant 0 : index
    %c0_157 = arith.constant 0 : index
    %271 = vector.load %arg18[%c0_156, %c0_157] : memref<1x32xf32, #tpu.memory_space<vmem>>, vector<1x32xf32>
    %272 = vector.broadcast %271 : vector<1x32xf32> to vector<16x32xf32>
    %273 = arith.addf %270, %272 : vector<16x32xf32>
    %274 = vector.shape_cast %273 : vector<16x32xf32> to vector<2x8x32xf32>
    %c0_158 = arith.constant 0 : index
    %c0_159 = arith.constant 0 : index
    %c0_160 = arith.constant 0 : index
    %275 = vector.load %arg21[%c0_158, %c0_159, %c0_160] : memref<2x8x32xf32, #tpu.memory_space<vmem>>, vector<2x8x32xf32>
    tpu.vector_store %arg21[%c0_158, %c0_159, %c0_160], %274 {strides = array<i32>} : memref<2x8x32xf32, #tpu.memory_space<vmem>>, vector<2x8x32xf32>,
    %276 = tpu.concatenate %50, %100, %150, %200 in 1 : vector<2x8x8xf32>, vector<2x8x8xf32>, vector<2x8x8xf32>, vector<2x8x8xf32> -> vector<2x32x8xf32>
    %277 = vector.shape_cast %276 : vector<2x32x8xf32> to vector<64x8xf32>
    %278 = arith.truncf %277 : vector<64x8xf32> to vector<64x8xbf16>
    %c0_161 = arith.constant 0 : index
    %c0_162 = arith.constant 0 : index
    %279 = vector.load %arg19[%c0_161, %c0_162] : memref<8x4xbf16, #tpu.memory_space<vmem>>, vector<8x4xbf16>
    %cst_163 = arith.constant dense<0.000000e+00> : vector<64x4xf32>
    %280 = tpu.matmul %278, %279, %cst_163 {dimension_numbers = #tpu.dot_dimension_numbers<[1], [0], [0], [1], [0, 0, 1, 1], [], []>} : vector<64x8xbf16>, vector<8x4xbf16>, vector<64x4xf32> -> vector<64x4xf32>
    %c0_164 = arith.constant 0 : index
    %c0_165 = arith.constant 0 : index
    %281 = vector.load %arg20[%c0_164, %c0_165] : memref<1x4xf32, #tpu.memory_space<vmem>>, vector<1x4xf32>
    %282 = vector.broadcast %281 : vector<1x4xf32> to vector<64x4xf32>
    %283 = arith.addf %280, %282 : vector<64x4xf32>
    %284 = vector.shape_cast %283 : vector<64x4xf32> to vector<2x32x4xf32>
    %c0_166 = arith.constant 0 : index
    %c0_167 = arith.constant 0 : index
    %c0_168 = arith.constant 0 : index
    %285 = vector.load %arg22[%c0_166, %c0_167, %c0_168] : memref<2x32x4xf32, #tpu.memory_space<vmem>>, vector<2x32x4xf32>
    tpu.vector_store %arg22[%c0_166, %c0_167, %c0_168], %284 {strides = array<i32>} : memref<2x32x4xf32, #tpu.memory_space<vmem>>, vector<2x32x4xf32>,
    return
  }
  func.func @transform_0(%arg0: i32) -> (i32, i32, i32) {
    %c0_i32 = arith.constant 0 : i32
    %c0_i32_0 = arith.constant 0 : i32
    %c0_i32_1 = arith.constant 0 : i32
    return %arg0, %c0_i32, %c0_i32_0 : i32, i32, i32
  }
  func.func @transform_1(%arg0: i32) -> (i32, i32, i32) {
    %c0_i32 = arith.constant 0 : i32
    %c0_i32_0 = arith.constant 0 : i32
    %c0_i32_1 = arith.constant 0 : i32
    return %arg0, %c0_i32, %c0_i32_0 : i32, i32, i32
  }
  func.func @transform_2(%arg0: i32) -> (i32, i32, i32) {
    %c0_i32 = arith.constant 0 : i32
    %c0_i32_0 = arith.constant 0 : i32
    %c0_i32_1 = arith.constant 0 : i32
    %c0_i32_2 = arith.constant 0 : i32
    return %c0_i32, %c0_i32_0, %c0_i32_1 : i32, i32, i32
  }
  func.func @transform_3(%arg0: i32) -> (i32, i32, i32) {
    %c0_i32 = arith.constant 0 : i32
    %c0_i32_0 = arith.constant 0 : i32
    %c0_i32_1 = arith.constant 0 : i32
    %c0_i32_2 = arith.constant 0 : i32
    return %c0_i32, %c0_i32_0, %c0_i32_1 : i32, i32, i32
  }
  func.func @transform_4(%arg0: i32) -> (i32, i32, i32) {
    %c0_i32 = arith.constant 0 : i32
    %c0_i32_0 = arith.constant 0 : i32
    %c0_i32_1 = arith.constant 0 : i32
    %c0_i32_2 = arith.constant 0 : i32
    return %c0_i32, %c0_i32_0, %c0_i32_1 : i32, i32, i32
  }
  func.func @transform_5(%arg0: i32) -> (i32, i32, i32) {
    %c0_i32 = arith.constant 0 : i32
    %c0_i32_0 = arith.constant 0 : i32
    %c0_i32_1 = arith.constant 0 : i32
    %c0_i32_2 = arith.constant 0 : i32
    return %c0_i32, %c0_i32_0, %c0_i32_1 : i32, i32, i32
  }
  func.func @transform_6(%arg0: i32) -> (i32, i32, i32) {
    %c0_i32 = arith.constant 0 : i32
    %c0_i32_0 = arith.constant 0 : i32
    %c0_i32_1 = arith.constant 0 : i32
    %c0_i32_2 = arith.constant 0 : i32
    return %c0_i32, %c0_i32_0, %c0_i32_1 : i32, i32, i32
  }
  func.func @transform_7(%arg0: i32) -> (i32, i32, i32) {
    %c0_i32 = arith.constant 0 : i32
    %c0_i32_0 = arith.constant 0 : i32
    %c0_i32_1 = arith.constant 0 : i32
    %c0_i32_2 = arith.constant 0 : i32
    return %c0_i32, %c0_i32_0, %c0_i32_1 : i32, i32, i32
  }
  func.func @transform_8(%arg0: i32) -> (i32, i32, i32) {
    %c0_i32 = arith.constant 0 : i32
    %c0_i32_0 = arith.constant 0 : i32
    %c0_i32_1 = arith.constant 0 : i32
    %c0_i32_2 = arith.constant 0 : i32
    return %c0_i32, %c0_i32_0, %c0_i32_1 : i32, i32, i32
  }
  func.func @transform_9(%arg0: i32) -> (i32, i32) {
    %c0_i32 = arith.constant 0 : i32
    %c0_i32_0 = arith.constant 0 : i32
    %c0_i32_1 = arith.constant 0 : i32
    return %c0_i32, %c0_i32_0 : i32, i32
  }
  func.func @transform_10(%arg0: i32) -> (i32, i32) {
    %c0_i32 = arith.constant 0 : i32
    %c0_i32_0 = arith.constant 0 : i32
    %c0_i32_1 = arith.constant 0 : i32
    return %c0_i32, %c0_i32_0 : i32, i32
  }
  func.func @transform_11(%arg0: i32) -> (i32, i32) {
    %c0_i32 = arith.constant 0 : i32
    %c0_i32_0 = arith.constant 0 : i32
    %c0_i32_1 = arith.constant 0 : i32
    return %c0_i32, %c0_i32_0 : i32, i32
  }
  func.func @transform_12(%arg0: i32) -> (i32, i32) {
    %c0_i32 = arith.constant 0 : i32
    %c0_i32_0 = arith.constant 0 : i32
    %c0_i32_1 = arith.constant 0 : i32
    return %c0_i32, %c0_i32_0 : i32, i32
  }
  func.func @transform_13(%arg0: i32) -> (i32, i32) {
    %c0_i32 = arith.constant 0 : i32
    %c0_i32_0 = arith.constant 0 : i32
    %c0_i32_1 = arith.constant 0 : i32
    return %c0_i32, %c0_i32_0 : i32, i32
  }
  func.func @transform_14(%arg0: i32) -> (i32, i32) {
    %c0_i32 = arith.constant 0 : i32
    %c0_i32_0 = arith.constant 0 : i32
    %c0_i32_1 = arith.constant 0 : i32
    return %c0_i32, %c0_i32_0 : i32, i32
  }
  func.func @transform_15(%arg0: i32) -> (i32, i32) {
    %c0_i32 = arith.constant 0 : i32
    %c0_i32_0 = arith.constant 0 : i32
    %c0_i32_1 = arith.constant 0 : i32
    return %c0_i32, %c0_i32_0 : i32, i32
  }
  func.func @transform_16(%arg0: i32) -> (i32, i32) {
    %c0_i32 = arith.constant 0 : i32
    %c0_i32_0 = arith.constant 0 : i32
    %c0_i32_1 = arith.constant 0 : i32
    return %c0_i32, %c0_i32_0 : i32, i32
  }
  func.func @transform_17(%arg0: i32) -> (i32, i32) {
    %c0_i32 = arith.constant 0 : i32
    %c0_i32_0 = arith.constant 0 : i32
    %c0_i32_1 = arith.constant 0 : i32
    return %c0_i32, %c0_i32_0 : i32, i32
  }
  func.func @transform_18(%arg0: i32) -> (i32, i32) {
    %c0_i32 = arith.constant 0 : i32
    %c0_i32_0 = arith.constant 0 : i32
    %c0_i32_1 = arith.constant 0 : i32
    return %c0_i32, %c0_i32_0 : i32, i32
  }
  func.func @transform_19(%arg0: i32) -> (i32, i32) {
    %c0_i32 = arith.constant 0 : i32
    %c0_i32_0 = arith.constant 0 : i32
    %c0_i32_1 = arith.constant 0 : i32
    return %c0_i32, %c0_i32_0 : i32, i32
  }
  func.func @transform_20(%arg0: i32) -> (i32, i32, i32) {
    %c0_i32 = arith.constant 0 : i32
    %c0_i32_0 = arith.constant 0 : i32
    %c0_i32_1 = arith.constant 0 : i32
    return %arg0, %c0_i32, %c0_i32_0 : i32, i32, i32
  }
  func.func @transform_21(%arg0: i32) -> (i32, i32, i32) {
    %c0_i32 = arith.constant 0 : i32
    %c0_i32_0 = arith.constant 0 : i32
    %c0_i32_1 = arith.constant 0 : i32
    return %arg0, %c0_i32, %c0_i32_0 : i32, i32, i32
  }
}

</mosaic_0001>

<bundles_post_ra>
// kernel: encoder_layer.1
= control target key start
LH: loop header
LB: loop body
LE: loop exit
PB: predicated region body
PF: predicated region fallthrough
CT: control target
= control target key end

     0   :  { %s2192_s0 = inlined_call_operand.vmem [shape: f32[2,8,32], index: 0, kind: input, shape index: {}]   ;;  %s2193_s1 = inlined_call_operand.vmem [shape: f32[2,8,8], index: 1, kind: input, shape index: {}]   ;;  %s2194_s2 = inlined_call_operand.vmem [shape: bf16[4,32,8], index: 2, kind: input, shape index: {}]   ;;  %s2195_s3 = inlined_call_operand.vmem [shape: f32[4,1,8], index: 3, kind: input, shape index: {}]   ;;  %s2196_s4 = inlined_call_operand.vmem [shape: bf16[4,32,8], index: 4, kind: input, shape index: {}]   ;;  %s2197_s5 = inlined_call_operand.vmem [shape: f32[4,1,8], index: 5, kind: input, shape index: {}]   ;;  %s2198_s6 = inlined_call_operand.vmem [shape: bf16[4,32,8], index: 6, kind: input, shape index: {}]   ;;  %s2199_s7 = inlined_call_operand.vmem [shape: f32[4,1,8], index: 7, kind: input, shape index: {}]   ;;  %s2200_s8 = inlined_call_operand.vmem [shape: bf16[4,8,32], index: 8, kind: input, shape index: {}]   ;;  %s2201_s9 = inlined_call_operand.vmem [shape: f32[1,32], index: 9, kind: input, shape index: {}]   ;;  %s2202_s10 = inlined_call_operand.vmem [shape: f32[1,32], index: 10, kind: input, shape index: {}]   ;;  %s2203_s11 = inlined_call_operand.vmem [shape: f32[1,32], index: 11, kind: input, shape index: {}]   ;;  %s2204_s12 = inlined_call_operand.vmem [shape: bf16[32,64], index: 12, kind: input, shape index: {}]   ;;  %s2205_s13 = inlined_call_operand.vmem [shape: f32[1,64], index: 13, kind: input, shape index: {}]   ;;  %s2206_s14 = inlined_call_operand.vmem [shape: bf16[64,32], index: 14, kind: input, shape index: {}]   ;;  %s2207_s15 = inlined_call_operand.vmem [shape: f32[1,32], index: 15, kind: input, shape index: {}]   ;;  %s2208_s16 = inlined_call_operand.vmem [shape: f32[1,32], index: 16, kind: input, shape index: {}]   ;;  %s2209_s17 = inlined_call_operand.vmem [shape: f32[1,32], index: 17, kind: input, shape index: {}]   ;;  %s2210_s18 = inlined_call_operand.vmem [shape: bf16[8,4], index: 18, kind: input, shape index: {}]   ;;  %s2211_s19 = inlined_call_operand.vmem [shape: f32[1,4], index: 19, kind: input, shape index: {}]   ;;  %s2212_s20 = inlined_call_operand.hbm [shape: f32[2,8,32], index: 20, kind: output, shape index: {0}]   ;;  %s2213_s21 = inlined_call_operand.vmem [shape: f32[2,32,4], index: 21, kind: output, shape index: {1}]  }
   0x1   :  { %2220 = sst [smem:[#allocation5_spill]] %s2192_s0 }
   0x2   :  { %2221 = sst [smem:[#allocation6_spill]] %s2193_s1 }
   0x3   :  { %2222 = sst [smem:[#allocation7_spill]] %s2194_s2 }
   0x4   :  { %2223 = sst [smem:[#allocation8_spill]] %s2195_s3 }
   0x5   :  { %2224 = sst [smem:[#allocation9_spill]] %s2196_s4 }
   0x6   :  { %2225 = sst [smem:[#allocation10_spill]] %s2197_s5 }
   0x7   :  { %2226 = sst [smem:[#allocation11_spill]] %s2208_s16 }
   0x8   :  { %s2227_s26 = sld [smem:[#allocation7_spill]]  ;;  %vm96_vm0 = vcmask 261120  }
   0x9   :  { %s2228_s16 = sld [smem:[#allocation9_spill]] }
   0xa   :  { %s2229_s22 = sld [smem:[#allocation5_spill]] }
   0xe   :  { %v1560_v0 = vld [vmem:[%s2227_s26 + $0x8] sm:$0xff]  ;;  %v1559_v2 = vld [vmem:[%s2227_s26] sm:$0xff] }
   0xf   :  { %v1562_v1 = vld [vmem:[%s2228_s16 + $0x8] sm:$0xff]  ;;  %v1561_v3 = vld [vmem:[%s2228_s16] sm:$0xff]  ;;  %106 = vmatpush.bf16.msra.mxu0 %v1560_v0 }
  0x10   :  { %v1811_v4 = vld [vmem:[%s2229_s22] sm:$0xff]  ;;  %140 = vmatpush.bf16.msra.mxu1 %v1562_v1  ;;  %v1816_v5 = vld [vmem:[%s2229_s22 + $0x8] sm:$0xff] }
  0x11   :  { %v1820_v6 = vpack.c.bf16 %v1816_v5, %v1811_v4 }
  0x13   :  { %107 = vmatpush.bf16.msra.mxu0 %v1559_v2 }
  0x14   :  { %141 = vmatpush.bf16.msra.mxu1 %v1561_v3 }
  0x15   :  { %27 = vsyncpa [#allocation3], 0  ;;  %s2230_s25 = sld [smem:[#allocation10_spill]]  ;;  %vm188_vm1 = vcmask 64512   ;;  %v1566_v13 = vld [vmem:[%s2227_s26 + $0x18] sm:$0xff]  ;;  %v1565_v16 = vld [vmem:[%s2227_s26 + $0x10] sm:$0xff] }
  0x16   :  { %1361 = vmatmul.msk.bf16.vlgmr.msra.gmra.mxu0 %vm96_vm0, %v1820_v6  ;;  %s2231_s28 = sld [smem:[#allocation8_spill]]  ;;  %v1568_v21 = vld [vmem:[%s2228_s16 + $0x18] sm:$0xff]  ;;  %v1567_v25 = vld [vmem:[%s2228_s16 + $0x10] sm:$0xff]  ;;  %v1564_v37 = vld [vmem:[%s2198_s6 + $0x8] sm:$0xff]  ;;  %vm258_vm4 = vcmask 1043456   ;;  %vm1322_vm5 = vcmask 31744  }
  0x17   :  { %1370 = vmatmul.msk.bf16.vlgmr.msra.gmra.mxu1 %vm96_vm0, %v1820_v6  ;;  %s2232_s27 = sld [smem:[#allocation6_spill]]  ;;  %174 = vmatpush.bf16.msra.mxu2 %v1564_v37  ;;  %v1563_v39 = vld [vmem:[%s2198_s6] sm:$0xff]  ;;  %vm1191_vm13 = vcmask 523264  }
  0x18   :  { %v1598_v0 = vld [vmem:[%s2199_s7] ss:$0 sm:$0xff] }
  0x19   :  { %v295_v37 = vld [vmem:[%s2200_s8] sm:$0xf] }
  0x1b   :  { %v1595_v7 = vld [vmem:[%s2230_s25] ss:$0 sm:$0xff]  ;;  %175 = vmatpush.bf16.msra.mxu2 %v1563_v39  ;;  %v1596_v43 = vld [vmem:[%s2230_s25 + $0x1] ss:$0 sm:$0xff] }
  0x1c   :  { %v1594_v9 = vld [vmem:[%s2231_s28] ss:$0 sm:$0xff]  ;;  %v1597_v41 = vld [vmem:[%s2231_s28 + $0x1] ss:$0 sm:$0xff] }
  0x1d   :  { %v1855_v27 = vld [vmem:[%s2232_s27] sm:$0xff]  ;;  %v1860_v28 = vld [vmem:[%s2232_s27 + $0x8] sm:$0xff] }
  0x1e   :  { %vm74_vm2 = vcmp.eq.f32.partialorder %v1855_v27, 0.0  ;;  %vm75_vm3 = vcmp.eq.f32.partialorder %v1860_v28, 0.0  ;;  %1379 = vmatmul.msk.bf16.vlgmr.msra.gmra.mxu2 %vm96_vm0, %v1820_v6 }
  0x93   :  { %v109_v11 = vpop.f32.mrf.mxu0 }
  0x94   :  { %v143_v8 = vpop.f32.mrf.mxu1  ;;  %v110_v14 = vadd.f32 %v1594_v9, %v109_v11 }
  0x95   :  { %v144_v10 = vadd.f32 %v1595_v7, %v143_v8 }
  0x96   :  { %v182_v18 = vpack.c.bf16 %v110_v14, %v110_v14 }
  0x97   :  { %v184_v12 = vpack.c.bf16 %v144_v10, %v144_v10 }
  0x99   :  { %v193_v15 = vsel %vm188_vm1, %v184_v12, 0 }
  0x9a   :  { %202 = vmatpush.bf16.xpose.msra.mxu3 %v193_v15 }
  0x9b   :  { %v111_v22 = vpop.f32.mrf.mxu0 }
  0x9c   :  { %v145_v17 = vpop.f32.mrf.mxu1  ;;  %v112_v24 = vadd.f32 %v1594_v9, %v111_v22 }
  0x9d   :  { %v146_v19 = vadd.f32 %v1595_v7, %v145_v17 }
  0x9e   :  { %v183_v26 = vpack.c.bf16 %v112_v24, %v112_v24 }
  0x9f   :  { %v185_v20 = vpack.c.bf16 %v146_v19, %v146_v19  ;;  %v1570_v19 = vld [vmem:[%s2198_s6 + $0x18] sm:$0xff] }
  0xa1   :  { %1380 = vmatmul.msk.bf16.vlgmr.msra.gmra.mxu3 %vm188_vm1, %v182_v18  ;;  %v212_v23 = vsel %vm188_vm1, %v185_v20, 0  ;;  %v177_v1 = vpop.f32.mrf.mxu2 }
  0xa2   :  { %324 = vmatpush.bf16.msrb.mxu3 %v1566_v13  ;;  %221 = vmatpush.bf16.xpose.msrb.mxu0 %v212_v23  ;;  %v178_v2 = vadd.f32 %v1598_v0, %v177_v1 }
  0xa4   :  { %v186_v3 = vpack.c.bf16 %v178_v2, %v178_v2 }
  0xa6   :  { %325 = vmatpush.bf16.msrb.mxu3 %v1565_v16  ;;  %v260_v7 = vsel %vm258_vm4, %v186_v3, 0 }
  0xa7   :  { %269 = vmatpush.bf16.msrb.mxu1 %v260_v7 }
  0xa9   :  { %1381 = vmatmul.msk.bf16.vlgmr.msrb.gmra.mxu0 %vm188_vm1, %v183_v26  ;;  %v179_v9 = vpop.f32.mrf.mxu2 }
  0xaa   :  { %360 = vmatpush.bf16.msra.mxu0 %v1568_v21  ;;  %v180_v10 = vadd.f32 %v1598_v0, %v179_v9  ;;  %v1569_v21 = vld [vmem:[%s2198_s6 + $0x10] sm:$0xff]  ;;  %v1573_v9 = vld [vmem:[%s2228_s16 + $0x20] sm:$0xff] }
  0xab   :  { %396 = vmatpush.bf16.msra.mxu1 %v1570_v19  ;;  %v1600_v19 = vld [vmem:[%s2230_s25 + $0x2] ss:$0 sm:$0xff] }
  0xac   :  { %v187_v11 = vpack.c.bf16 %v180_v10, %v180_v10  ;;  %v1572_v10 = vld [vmem:[%s2227_s26 + $0x28] sm:$0xff] }
  0xae   :  { %361 = vmatpush.bf16.msra.mxu0 %v1567_v25  ;;  %v279_v13 = vsel %vm258_vm4, %v187_v11, 0  ;;  %v1571_v11 = vld [vmem:[%s2227_s26 + $0x20] sm:$0xff] }
  0xaf   :  { %288 = vmatpush.bf16.msrb.mxu2 %v279_v13  ;;  %397 = vmatpush.bf16.msra.mxu1 %v1569_v21 }
  0xb1   :  { %1397 = vmatmul.msk.bf16.vlgmr.msrb.gmra.mxu3 %vm96_vm0, %v1820_v6 }
  0xb9   :  { %1411 = vmatmul.msk.bf16.vlgmr.msra.gmra.mxu0 %vm96_vm0, %v1820_v6 }
 0x124   :  { %v204_v29 = vpop.f32.mrf.mxu3 }
 0x125   :  { %v227_v30 = vmul.f32 0.35355338, %v204_v29 }
 0x126   :  { %v223_v31 = vpop.f32.mrf.mxu0 }
 0x127   :  { %v228_v32 = vmul.f32 0.35355338, %v223_v31  ;;  %v229_v33 = vsel %vm74_vm2, -1e+09, %v227_v30 }
 0x128   :  { %v231_v34 = vsel %vm188_vm1, %v229_v33, -inf }
 0x129   :  { %232 = vmax.xlane.f32.xlu1 %v231_v34  ;;  %v230_v35 = vsel %vm75_vm3, -1e+09, %v228_v32 }
 0x12a   :  { %v234_v36 = vsel %vm188_vm1, %v230_v35, -inf }
 0x12b   :  { %235 = vmax.xlane.f32.xlu0 %v234_v36 }
 0x12c   :  { %v206_v38 = vpop.f32.mrf.mxu3 }
 0x12d   :  { %v541_v38 = vsel %vm258_vm4, %v295_v37, 0 }
 0x12e   :  { %v225_v40 = vpop.f32.mrf.mxu0 }
 0x134   :  { %v327_v42 = vpop.f32.mrf.mxu3 }
 0x135   :  { %v1884_v44 = vadd.f32 %v1597_v41, %v327_v42 }
 0x136   :  { %v363_v45 = vpop.f32.mrf.mxu0 }
 0x137   :  { %v364_v46 = vadd.f32 %v1596_v43, %v363_v45  ;;  %v404_v31 = vpack.c.bf16 %v1884_v44, %v1884_v44 }
 0x139   :  { %v406_v8 = vpack.c.bf16 %v364_v46, %v364_v46 }
 0x13b   :  { %v414_v12 = vsel %vm188_vm1, %v406_v8, 0  ;;  %v1574_v8 = vld [vmem:[%s2228_s16 + $0x28] sm:$0xff] }
 0x13c   :  { %v329_v49 = vpop.f32.mrf.mxu3  ;;  %423 = vmatpush.bf16.xpose.msra.mxu2 %v414_v12 }
 0x13d   :  { %v330_v52 = vadd.f32 %v1597_v41, %v329_v49 }
 0x13e   :  { %v365_v47 = vpop.f32.mrf.mxu0 }
 0x13f   :  { %v366_v48 = vadd.f32 %v1596_v43, %v365_v47  ;;  %v405_v53 = vpack.c.bf16 %v330_v52, %v330_v52  ;;  %v1599_v43 = vld [vmem:[%s2199_s7 + $0x1] ss:$0 sm:$0xff] }
 0x141   :  { %v407_v50 = vpack.c.bf16 %v366_v48, %v366_v48 }
 0x143   :  { %v433_v51 = vsel %vm188_vm1, %v407_v50, 0 }
 0x144   :  { %442 = vmatpush.bf16.xpose.msra.mxu3 %v433_v51 }
 0x14b   :  { %1427 = vmatmul.msk.bf16.vlgmr.msra.gmra.mxu3 %vm188_vm1, %v405_v53 }
 0x14c   :  { %550 = vmatpush.bf16.msrb.mxu3 %v541_v38 }
 0x19c   :  { %v233_v54 = vpop.xlane.xlu1 %232 }
 0x19d   :  { %v237_v55 = vsub.f32 %v229_v33, %v233_v54 }
 0x19e   :  { %v236_v56 = vpop.xlane.xlu0 %235 }
 0x19f   :  { %v239_v57 = vmul.f32 1.442695, %v237_v55  ;;  %v238_v58 = vsub.f32 %v230_v35, %v236_v56 }
 0x1a1   :  { %1614 = vpow2.f32 %v239_v57  ;;  %v241_v59 = vmul.f32 1.442695, %v238_v58 }
 0x1a3   :  { %1616 = vpow2.f32 %v241_v59 }
 0x1a7   :  { %v1615_v60 = vpop.eup %1614 }
 0x1a8   :  { %v243_v61 = vsel %vm188_vm1, %v1615_v60, 0.0 }
 0x1a9   :  { %v1617_v62 = vpop.eup %1616  ;;  %244 = vadd.xlane.f32.xlu1 %v243_v61 }
 0x1aa   :  { %v246_v63 = vsel %vm188_vm1, %v1617_v62, 0.0 }
 0x1ab   :  { %247 = vadd.xlane.f32.xlu0 %v246_v63 }
 0x1ce   :  { %v444_v14 = vpop.f32.mrf.mxu3 }
 0x1cf   :  { %v449_v15 = vmul.f32 0.35355338, %v444_v14 }
 0x1d1   :  { %v451_v16 = vsel %vm75_vm3, -1e+09, %v449_v15 }
 0x1d2   :  { %v455_v17 = vsel %vm188_vm1, %v451_v16, -inf }
 0x1d3   :  { %456 = vmax.xlane.f32.xlu2 %v455_v17 }
 0x1d6   :  { %v446_v18 = vpop.f32.mrf.mxu3 }
 0x21c   :  { %v245_v20 = vpop.xlane.xlu1 %244 }
 0x21d   :  { %1618 = vrcp.f32 %v245_v20 }
 0x21e   :  { %v248_v22 = vpop.xlane.xlu0 %247 }
 0x21f   :  { %1620 = vrcp.f32 %v248_v22 }
 0x223   :  { %v1619_v23 = vpop.eup %1618 }
 0x224   :  { %v251_v24 = vmul.f32 %v1619_v23, %v1615_v60 }
 0x225   :  { %v1621_v25 = vpop.eup %1620 }
 0x226   :  { %v252_v26 = vmul.f32 %v1621_v25, %v1617_v62  ;;  %v253_v29 = vpack.c.bf16 %v251_v24, %v251_v24 }
 0x228   :  { %1382 = vmatmul.msk.bf16.vlgmr.msrb.gmra.mxu1 %vm188_vm1, %v253_v29  ;;  %v254_v30 = vpack.c.bf16 %v252_v26, %v252_v26 }
 0x22a   :  { %1383 = vmatmul.msk.bf16.vlgmr.msrb.gmra.mxu2 %vm188_vm1, %v254_v30 }
 0x238   :  { %1425 = vmatmul.msk.bf16.vlgmr.msra.gmra.mxu1 %vm96_vm0, %v1820_v6 }
 0x23a   :  { %1426 = vmatmul.msk.bf16.vlgmr.msra.gmra.mxu2 %vm188_vm1, %v404_v31 }
 0x246   :  { %v457_v32 = vpop.xlane.xlu2 %456 }
 0x247   :  { %v459_v33 = vsub.f32 %v451_v16, %v457_v32  ;;  %v1430_v16 = vld [vmem:[%s2200_s8 + $0x4] sm:$0xf]  ;;  %v1601_v32 = vld [vmem:[%s2231_s28 + $0x2] ss:$0 sm:$0xff] }
 0x248   :  { %v521_v17 = vsel %vm258_vm4, %v1430_v16, 0  ;;  %v1580_v16 = vld [vmem:[%s2228_s16 + $0x38] sm:$0xff] }
 0x249   :  { %v462_v34 = vmul.f32 1.442695, %v459_v33  ;;  %530 = vmatpush.bf16.msrb.mxu2 %v521_v17  ;;  %v1579_v17 = vld [vmem:[%s2228_s16 + $0x30] sm:$0xff] }
 0x24b   :  { %1622 = vpow2.f32 %v462_v34 }
 0x251   :  { %v1623_v35 = vpop.eup %1622 }
 0x252   :  { %v467_v36 = vsel %vm188_vm1, %v1623_v35, 0.0 }
 0x253   :  { %468 = vadd.xlane.f32.xlu0 %v467_v36 }
 0x2a5   :  { %v1917_v39 = vpop.f32.mrf.mxu1 }
 0x2ad   :  { %v273_v40 = vpop.f32.mrf.mxu1  ;;  %v1919_v41 = vpop.f32.mrf.mxu2 }
 0x2ae   :  { %v294_v42 = vpack.c.bf16 %v1919_v41, %v1917_v39  ;;  %v1576_v40 = vld [vmem:[%s2198_s6 + $0x28] sm:$0xff] }
 0x2af   :  { %657 = vmatpush.bf16.msra.mxu2 %v1576_v40 }
 0x2b0   :  { %1432 = vmatmul.msk.bf16.vlgmr.msrb.gmra.mxu3 %vm188_vm1, %v294_v42  ;;  %v1575_v42 = vld [vmem:[%s2198_s6 + $0x20] sm:$0xff] }
 0x2b3   :  { %658 = vmatpush.bf16.msra.mxu2 %v1575_v42 }
 0x2b5   :  { %v292_v44 = vpop.f32.mrf.mxu2  ;;  %v399_v45 = vpop.f32.mrf.mxu1 }
 0x2b6   :  { %v400_v46 = vadd.f32 %v1599_v43, %v399_v45 }
 0x2b8   :  { %v408_v47 = vpack.c.bf16 %v400_v46, %v400_v46 }
 0x2ba   :  { %v480_v48 = vsel %vm258_vm4, %v408_v47, 0 }
 0x2bb   :  { %489 = vmatpush.bf16.msrb.mxu0 %v480_v48 }
 0x2bd   :  { %v425_v49 = vpop.f32.mrf.mxu2  ;;  %v401_v50 = vpop.f32.mrf.mxu1 }
 0x2be   :  { %v448_v51 = vmul.f32 0.35355338, %v425_v49  ;;  %v402_v52 = vadd.f32 %v1599_v43, %v401_v50 }
 0x2bf   :  { %585 = vmatpush.bf16.msra.mxu0 %v1572_v10 }
 0x2c0   :  { %v450_v53 = vsel %vm74_vm2, -1e+09, %v448_v51  ;;  %v409_v54 = vpack.c.bf16 %v402_v52, %v402_v52 }
 0x2c1   :  { %v452_v55 = vsel %vm188_vm1, %v450_v53, -inf }
 0x2c2   :  { %453 = vmax.xlane.f32.xlu2 %v452_v55  ;;  %v499_v56 = vsel %vm258_vm4, %v409_v54, 0 }
 0x2c3   :  { %508 = vmatpush.bf16.msrb.mxu1 %v499_v56  ;;  %586 = vmatpush.bf16.msra.mxu0 %v1571_v11 }
 0x2c5   :  { %v427_v57 = vpop.f32.mrf.mxu2 }
 0x2c6   :  { %v469_v58 = vpop.xlane.xlu0 %468  ;;  %v1602_v57 = vld [vmem:[%s2199_s7 + $0x2] ss:$0 sm:$0xff] }
 0x2c7   :  { %1624 = vrcp.f32 %v469_v58  ;;  %621 = vmatpush.bf16.msra.mxu1 %v1574_v8 }
 0x2cb   :  { %622 = vmatpush.bf16.msra.mxu1 %v1573_v9 }
 0x2cd   :  { %v1625_v59 = vpop.eup %1624 }
 0x2ce   :  { %v473_v60 = vmul.f32 %v1625_v59, %v1623_v35 }
 0x2d0   :  { %v475_v61 = vpack.c.bf16 %v473_v60, %v473_v60 }
 0x2d2   :  { %1429 = vmatmul.msk.bf16.vlgmr.msrb.gmra.mxu1 %vm188_vm1, %v475_v61 }
 0x2e2   :  { %1460 = vmatmul.msk.bf16.vlgmr.msra.gmra.mxu1 %vm96_vm0, %v1820_v6 }
 0x333   :  { %v1978_v43 = vpop.f32.mrf.mxu3 }
 0x335   :  { %v454_v62 = vpop.xlane.xlu2 %453 }
 0x336   :  { %v458_v63 = vsub.f32 %v450_v53, %v454_v62 }
 0x338   :  { %v460_v0 = vmul.f32 1.442695, %v458_v63 }
 0x33a   :  { %1626 = vpow2.f32 %v460_v0 }
 0x33b   :  { %v1982_v44 = vpop.f32.mrf.mxu3 }
 0x340   :  { %v1627_v1 = vpop.eup %1626 }
 0x341   :  { %v464_v2 = vsel %vm188_vm1, %v1627_v1, 0.0 }
 0x342   :  { %465 = vadd.xlane.f32.xlu1 %v464_v2 }
 0x34f   :  { %v1934_v3 = vpop.f32.mrf.mxu1 }
 0x357   :  { %v512_v7 = vpop.f32.mrf.mxu1 }
 0x35f   :  { %v624_v18 = vpop.f32.mrf.mxu1 }
 0x360   :  { %v625_v20 = vadd.f32 %v1600_v19, %v624_v18  ;;  %v1578_v18 = vld [vmem:[%s2227_s26 + $0x38] sm:$0xff] }
 0x362   :  { %v667_v21 = vpack.c.bf16 %v625_v20, %v625_v20 }
 0x364   :  { %v675_v22 = vsel %vm188_vm1, %v667_v21, 0 }
 0x365   :  { %684 = vmatpush.bf16.xpose.msra.mxu3 %v675_v22 }
 0x367   :  { %v626_v23 = vpop.f32.mrf.mxu1 }
 0x368   :  { %v627_v24 = vadd.f32 %v1600_v19, %v626_v23  ;;  %v1577_v19 = vld [vmem:[%s2227_s26 + $0x30] sm:$0xff] }
 0x36a   :  { %v668_v25 = vpack.c.bf16 %v627_v24, %v627_v24 }
 0x36c   :  { %v694_v26 = vsel %vm188_vm1, %v668_v25, 0 }
 0x3b5   :  { %v466_v12 = vpop.xlane.xlu1 %465 }
 0x3b6   :  { %1628 = vrcp.f32 %v466_v12 }
 0x3bc   :  { %v1629_v13 = vpop.eup %1628 }
 0x3bd   :  { %v472_v14 = vmul.f32 %v1629_v13, %v1627_v1 }
 0x3bf   :  { %v474_v15 = vpack.c.bf16 %v472_v14, %v472_v14 }
 0x3c1   :  { %1428 = vmatmul.msk.bf16.vlgmr.msrb.gmra.mxu0 %vm188_vm1, %v474_v15 }
 0x3c2   :  { %703 = vmatpush.bf16.xpose.msrb.mxu0 %v694_v26 }
 0x3d1   :  { %1446 = vmatmul.msk.bf16.vlgmr.msra.gmra.mxu0 %vm96_vm0, %v1820_v6 }
 0x3d2   :  { %828 = vmatpush.bf16.msra.mxu0 %v1578_v18 }
 0x3d6   :  { %829 = vmatpush.bf16.msra.mxu0 %v1577_v19 }
 0x43e   :  { %v1962_v29 = vpop.f32.mrf.mxu0 }
 0x43f   :  { %v514_v30 = vpack.c.bf16 %v1934_v3, %v1962_v29 }
 0x441   :  { %1431 = vmatmul.msk.bf16.vlgmr.msrb.gmra.mxu2 %vm188_vm1, %v514_v30 }
 0x446   :  { %v493_v31 = vpop.f32.mrf.mxu0 }
 0x447   :  { %v1479_v31 = vld [vmem:[%s2200_s8 + $0x8] sm:$0xf] }
 0x44e   :  { %v588_v33 = vpop.f32.mrf.mxu0 }
 0x44f   :  { %v589_v34 = vadd.f32 %v1601_v32, %v588_v33 }
 0x451   :  { %v665_v35 = vpack.c.bf16 %v589_v34, %v589_v34  ;;  %1474 = vmatmul.msk.bf16.vlgmr.msra.gmra.mxu2 %vm96_vm0, %v1820_v6 }
 0x453   :  { %1475 = vmatmul.msk.bf16.vlgmr.msra.gmra.mxu3 %vm188_vm1, %v665_v35 }
 0x456   :  { %v590_v36 = vpop.f32.mrf.mxu0 }
 0x457   :  { %v591_v37 = vadd.f32 %v1601_v32, %v590_v36  ;;  %v782_v32 = vsel %vm258_vm4, %v1479_v31, 0 }
 0x458   :  { %791 = vmatpush.bf16.msrb.mxu3 %v782_v32 }
 0x459   :  { %v666_v38 = vpack.c.bf16 %v591_v37, %v591_v37  ;;  %v1603_v37 = vld [vmem:[%s2230_s25 + $0x3] ss:$0 sm:$0xff] }
 0x45b   :  { %1476 = vmatmul.msk.bf16.vlgmr.msrb.gmra.mxu0 %vm188_vm1, %v666_v38 }
 0x46b   :  { %1494 = vmatmul.msk.bf16.vlgmr.msra.gmra.mxu0 %vm96_vm0, %v1820_v6 }
 0x4c4   :  { %v1990_v55 = vpop.f32.mrf.mxu2 }
 0x4cc   :  { %v1992_v56 = vpop.f32.mrf.mxu2 }
 0x4d4   :  { %v660_v58 = vpop.f32.mrf.mxu2 }
 0x4d5   :  { %v661_v59 = vadd.f32 %v1602_v57, %v660_v58 }
 0x4d6   :  { %v686_v45 = vpop.f32.mrf.mxu3 }
 0x4d7   :  { %v709_v46 = vmul.f32 0.35355338, %v686_v45  ;;  %v669_v62 = vpack.c.bf16 %v661_v59, %v661_v59  ;;  %v1604_v45 = vld [vmem:[%s2231_s28 + $0x3] ss:$0 sm:$0xff] }
 0x4d8   :  { %v705_v47 = vpop.f32.mrf.mxu0 }
 0x4d9   :  { %v710_v48 = vmul.f32 0.35355338, %v705_v47  ;;  %v711_v49 = vsel %vm74_vm2, -1e+09, %v709_v46  ;;  %v741_v2 = vsel %vm258_vm4, %v669_v62, 0  ;;  %v553_v62 = vadd.f32 %v1978_v43, %v1990_v55 }
 0x4da   :  { %v713_v50 = vsel %vm188_vm1, %v711_v49, -inf  ;;  %750 = vmatpush.bf16.msrb.mxu1 %v741_v2 }
 0x4db   :  { %714 = vmax.xlane.f32.xlu2 %v713_v50  ;;  %v712_v51 = vsel %vm75_vm3, -1e+09, %v710_v48 }
 0x4dc   :  { %v716_v52 = vsel %vm188_vm1, %v712_v51, -inf  ;;  %v662_v8 = vpop.f32.mrf.mxu2 }
 0x4dd   :  { %717 = vmax.xlane.f32.xlu0 %v716_v52  ;;  %v663_v9 = vadd.f32 %v1602_v57, %v662_v8 }
 0x4de   :  { %v688_v53 = vpop.f32.mrf.mxu3  ;;  %864 = vmatpush.bf16.msra.mxu1 %v1580_v16 }
 0x4df   :  { %v670_v10 = vpack.c.bf16 %v663_v9, %v663_v9 }
 0x4e0   :  { %v707_v54 = vpop.f32.mrf.mxu0 }
 0x4e1   :  { %v760_v12 = vsel %vm258_vm4, %v670_v10, 0 }
 0x4e2   :  { %769 = vmatpush.bf16.msrb.mxu2 %v760_v12  ;;  %865 = vmatpush.bf16.msra.mxu1 %v1579_v17 }
 0x4e8   :  { %v831_v46 = vpop.f32.mrf.mxu0 }
 0x4f0   :  { %v833_v54 = vpop.f32.mrf.mxu0 }
 0x4f1   :  { %v834_v58 = vadd.f32 %v1604_v45, %v833_v54 }
 0x4f3   :  { %v909_v59 = vpack.c.bf16 %v834_v58, %v834_v58 }
 0x54e   :  { %v715_v60 = vpop.xlane.xlu2 %714 }
 0x54f   :  { %v719_v61 = vsub.f32 %v711_v49, %v715_v60  ;;  %v832_v49 = vadd.f32 %v1604_v45, %v831_v46  ;;  %v1582_v60 = vld [vmem:[%s2198_s6 + $0x38] sm:$0xff] }
 0x550   :  { %v718_v63 = vpop.xlane.xlu0 %717  ;;  %900 = vmatpush.bf16.msra.mxu2 %v1582_v60  ;;  %v1271_v60 = vpack.c.bf16 %v1934_v3, %v1919_v41 }
 0x551   :  { %v721_v0 = vmul.f32 1.442695, %v719_v61  ;;  %v720_v1 = vsub.f32 %v712_v51, %v718_v63  ;;  %v908_v51 = vpack.c.bf16 %v832_v49, %v832_v49  ;;  %v1581_v61 = vld [vmem:[%s2198_s6 + $0x30] sm:$0xff]  ;;  %v1269_v49 = vpack.c.bf16 %v1962_v29, %v1917_v39  ;;  %v1606_v29 = vld [vmem:[%s2211_s19] ss:$0 sm:$0xff]  ;;  %s1683_s6 = smov [#allocation2]  }
 0x552   :  { %s1335_s22 = sshll.u32 %s1683_s6, 4  ;;  %s1336_s22 = int_to_ptr.vmem [resolvable:$true] %s1335_s22 }
 0x553   :  { %1630 = vpow2.f32 %v721_v0  ;;  %v723_v7 = vmul.f32 1.442695, %v720_v1  ;;  %v555_v1 = vadd.f32 %v1982_v44, %v1992_v56 }
 0x554   :  { %901 = vmatpush.bf16.msra.mxu2 %v1581_v61 }
 0x555   :  { %1632 = vpow2.f32 %v723_v7 }
 0x559   :  { %v1631_v11 = vpop.eup %1630 }
 0x55a   :  { %v725_v13 = vsel %vm188_vm1, %v1631_v11, 0.0 }
 0x55b   :  { %v1633_v14 = vpop.eup %1632  ;;  %726 = vadd.xlane.f32.xlu1 %v725_v13  ;;  %v1605_v13 = vld [vmem:[%s2199_s7 + $0x3] ss:$0 sm:$0xff] }
 0x55c   :  { %v728_v15 = vsel %vm188_vm1, %v1633_v14, 0.0 }
 0x55d   :  { %729 = vadd.xlane.f32.xlu2 %v728_v15 }
 0x5ce   :  { %v727_v20 = vpop.xlane.xlu1 %726 }
 0x5cf   :  { %1634 = vrcp.f32 %v727_v20 }
 0x5d0   :  { %v730_v21 = vpop.xlane.xlu2 %729 }
 0x5d1   :  { %1636 = vrcp.f32 %v730_v21 }
 0x5d5   :  { %v1635_v22 = vpop.eup %1634 }
 0x5d6   :  { %v733_v23 = vmul.f32 %v1635_v22, %v1631_v11 }
 0x5d7   :  { %v1637_v24 = vpop.eup %1636 }
 0x5d8   :  { %v735_v25 = vpack.c.bf16 %v733_v23, %v733_v23  ;;  %v734_v26 = vmul.f32 %v1637_v24, %v1633_v14 }
 0x5da   :  { %v736_v30 = vpack.c.bf16 %v734_v26, %v734_v26  ;;  %1477 = vmatmul.msk.bf16.vlgmr.msrb.gmra.mxu1 %vm188_vm1, %v735_v25 }
 0x5dc   :  { %1478 = vmatmul.msk.bf16.vlgmr.msrb.gmra.mxu2 %vm188_vm1, %v736_v30 }
 0x5ea   :  { %1508 = vmatmul.msk.bf16.vlgmr.msra.gmra.mxu1 %vm96_vm0, %v1820_v6 }
 0x5ec   :  { %1522 = vmatmul.msk.bf16.vlgmr.msra.gmra.mxu2 %vm96_vm0, %v1820_v6 }
 0x657   :  { %v2023_v33 = vpop.f32.mrf.mxu1 }
 0x65f   :  { %v754_v34 = vpop.f32.mrf.mxu1  ;;  %v2025_v35 = vpop.f32.mrf.mxu2 }
 0x660   :  { %v775_v36 = vpack.c.bf16 %v2025_v35, %v2023_v33  ;;  %v1273_v34 = vld [vmem:[%s2210_s18] sm:$0xf]  ;;  %s1685_s18 = smov 8  }
 0x662   :  { %1480 = vmatmul.msk.bf16.vlgmr.msrb.gmra.mxu3 %vm188_vm1, %v775_v36  ;;  %v1291_v36 = vsel %vm258_vm4, %v1273_v34, 0 }
 0x667   :  { %v773_v38 = vpop.f32.mrf.mxu2  ;;  %v867_v40 = vpop.f32.mrf.mxu1 }
 0x668   :  { %v868_v42 = vadd.f32 %v1603_v37, %v867_v40 }
 0x66a   :  { %v910_v47 = vpack.c.bf16 %v868_v42, %v868_v42 }
 0x66c   :  { %v918_v48 = vsel %vm188_vm1, %v910_v47, 0 }
 0x66d   :  { %927 = vmatpush.bf16.xpose.msra.mxu3 %v918_v48 }
 0x66f   :  { %v869_v50 = vpop.f32.mrf.mxu1  ;;  %v903_v14 = vpop.f32.mrf.mxu2 }
 0x670   :  { %v870_v52 = vadd.f32 %v1603_v37, %v869_v50  ;;  %v904_v15 = vadd.f32 %v1605_v13, %v903_v14  ;;  %v1527_v50 = vld [vmem:[%s2200_s8 + $0xc] sm:$0xf] }
 0x672   :  { %v911_v53 = vpack.c.bf16 %v870_v52, %v870_v52  ;;  %v912_v17 = vpack.c.bf16 %v904_v15, %v904_v15 }
 0x674   :  { %v937_v57 = vsel %vm188_vm1, %v911_v53, 0  ;;  %1523 = vmatmul.msk.bf16.vlgmr.msra.gmra.mxu3 %vm188_vm1, %v908_v51  ;;  %v984_v28 = vsel %vm258_vm4, %v912_v17, 0  ;;  %v1025_v51 = vsel %vm258_vm4, %v1527_v50, 0 }
 0x675   :  { %946 = vmatpush.bf16.xpose.msrb.mxu0 %v937_v57  ;;  %993 = vmatpush.bf16.msrb.mxu1 %v984_v28 }
 0x676   :  { %1034 = vmatpush.bf16.msrb.mxu3 %v1025_v51 }
 0x677   :  { %v905_v22 = vpop.f32.mrf.mxu2 }
 0x678   :  { %v906_v23 = vadd.f32 %v1605_v13, %v905_v22 }
 0x67a   :  { %v913_v24 = vpack.c.bf16 %v906_v23, %v906_v23  ;;  %1589 = vmatpush.bf16.msra.mxu3 %v1291_v36 }
 0x67c   :  { %1524 = vmatmul.msk.bf16.vlgmr.msrb.gmra.mxu0 %vm188_vm1, %v909_v59  ;;  %v1003_v26 = vsel %vm258_vm4, %v913_v24, 0 }
 0x67d   :  { %1012 = vmatpush.bf16.msrb.mxu2 %v1003_v26 }
 0x681   :  { %1300 = vmatpush.bf16.msra.mxu2 %v1291_v36 }
 0x6e5   :  { %v793_v63 = vpop.f32.mrf.mxu3 }
 0x6e6   :  { %v2048_v0 = vadd.f32 %v793_v63, %v553_v62 }
 0x6ed   :  { %v795_v2 = vpop.f32.mrf.mxu3 }
 0x6ee   :  { %v2054_v7 = vadd.f32 %v795_v2, %v555_v1  ;;  %v1607_v1 = vld [vmem:[%s2201_s9] ss:$0 sm:$0xff] }
 0x6f7   :  { %v929_v8 = vpop.f32.mrf.mxu3 }
 0x6f8   :  { %v952_v9 = vmul.f32 0.35355338, %v929_v8 }
 0x6f9   :  { %v948_v10 = vpop.f32.mrf.mxu0 }
 0x6fa   :  { %v953_v11 = vmul.f32 0.35355338, %v948_v10  ;;  %v954_v43 = vsel %vm74_vm2, -1e+09, %v952_v9 }
 0x6fb   :  { %v956_v55 = vsel %vm188_vm1, %v954_v43, -inf }
 0x6fc   :  { %957 = vmax.xlane.f32.xlu1 %v956_v55  ;;  %v955_v12 = vsel %vm75_vm3, -1e+09, %v953_v11 }
 0x6fd   :  { %v959_v6 = vsel %vm188_vm1, %v955_v12, -inf }
 0x6fe   :  { %960 = vmax.xlane.f32.xlu0 %v959_v6 }
 0x6ff   :  { %v931_v44 = vpop.f32.mrf.mxu3 }
 0x701   :  { %v950_v56 = vpop.f32.mrf.mxu0 }
 0x76f   :  { %v958_v16 = vpop.xlane.xlu1 %957 }
 0x770   :  { %v962_v27 = vsub.f32 %v954_v43, %v958_v16 }
 0x771   :  { %v961_v18 = vpop.xlane.xlu0 %960 }
 0x772   :  { %v964_v19 = vmul.f32 1.442695, %v962_v27  ;;  %v963_v20 = vsub.f32 %v955_v12, %v961_v18  ;;  %v1682_v27 = vmov 32.0  }
 0x774   :  { %1638 = vpow2.f32 %v964_v19  ;;  %v966_v21 = vmul.f32 1.442695, %v963_v20 }
 0x776   :  { %1640 = vpow2.f32 %v966_v21 }
 0x77a   :  { %v1639_v25 = vpop.eup %1638 }
 0x77b   :  { %v968_v30 = vsel %vm188_vm1, %v1639_v25, 0.0 }
 0x77c   :  { %v1641_v31 = vpop.eup %1640  ;;  %969 = vadd.xlane.f32.xlu0 %v968_v30 }
 0x77d   :  { %v971_v32 = vsel %vm188_vm1, %v1641_v31, 0.0 }
 0x77e   :  { %972 = vadd.xlane.f32.xlu2 %v971_v32 }
 0x7ef   :  { %v970_v37 = vpop.xlane.xlu0 %969 }
 0x7f0   :  { %1642 = vrcp.f32 %v970_v37  ;;  %v1584_v37 = vld [vmem:[%s2204_s12 + $0x8] sm:$0xff] }
 0x7f1   :  { %v973_v38 = vpop.xlane.xlu2 %972  ;;  %1144 = vmatpush.bf16.msra.mxu0 %v1584_v37 }
 0x7f2   :  { %1644 = vrcp.f32 %v973_v38 }
 0x7f3   :  { %1646 = vrcp.f32 %v1682_v27 }
 0x7f6   :  { %v1643_v40 = vpop.eup %1642 }
 0x7f7   :  { %v976_v42 = vmul.f32 %v1643_v40, %v1639_v25 }
 0x7f8   :  { %v1645_v45 = vpop.eup %1644 }
 0x7f9   :  { %v978_v46 = vpack.c.bf16 %v976_v42, %v976_v42  ;;  %v977_v47 = vmul.f32 %v1645_v45, %v1641_v31  ;;  %v1647_v17 = vpop.eup %1646  ;;  %v1583_v42 = vld [vmem:[%s2204_s12] sm:$0xff] }
 0x7fa   :  { %v1058_v18 = vmul.f32 32.0, %v1647_v17  ;;  %vm1062_vm6 = vweird.f32 %v1647_v17  ;;  %1145 = vmatpush.bf16.msra.mxu0 %v1583_v42 }
 0x7fb   :  { %v979_v48 = vpack.c.bf16 %v977_v47, %v977_v47  ;;  %1525 = vmatmul.msk.bf16.vlgmr.msrb.gmra.mxu1 %vm188_vm1, %v978_v46 }
 0x7fc   :  { %v1059_v19 = vsub.f32 1.0, %v1058_v18 }
 0x7fd   :  { %1526 = vmatmul.msk.bf16.vlgmr.msrb.gmra.mxu2 %vm188_vm1, %v979_v48 }
 0x7fe   :  { %v1060_v20 = vmul.f32 %v1647_v17, %v1059_v19 }
 0x800   :  { %v1061_v28 = vadd.f32 %v1647_v17, %v1060_v20 }
 0x802   :  { %v2134_v21 = vsel %vm1062_vm6, %v1647_v17, %v1061_v28 }
 0x80d   :  { %1555 = vmatmul.msk.bf16.vlgmr.msra.gmra.mxu2 %vm188_vm1, %v1269_v49 }
 0x878   :  { %v995_v52 = vpop.f32.mrf.mxu1 }
 0x879   :  { %v1270_v53 = vpack.c.bf16 %v995_v52, %v2023_v33 }
 0x87b   :  { %1556 = vmatmul.msk.bf16.gmra.mxu2 %vm188_vm1, %v1270_v53 }
 0x880   :  { %v997_v54 = vpop.f32.mrf.mxu1  ;;  %v1014_v57 = vpop.f32.mrf.mxu2 }
 0x881   :  { %v1018_v58 = vpack.c.bf16 %v1014_v57, %v995_v52  ;;  %v1272_v63 = vpack.c.bf16 %v1014_v57, %v2025_v35 }
 0x883   :  { %1528 = vmatmul.msk.bf16.vlgmr.msrb.gmra.mxu3 %vm188_vm1, %v1018_v58 }
 0x888   :  { %v1016_v39 = vpop.f32.mrf.mxu2 }
 0x890   :  { %v1302_v59 = vpop.f32.mrf.mxu2 }
 0x891   :  { %v1303_v61 = vadd.f32 %v1606_v29, %v1302_v59 }
 0x893   :  { %1323 = vst.msk [vmem:[%s2213_s21] sm:$0xff] %vm1322_vm5, %v1303_v61  ;;  %1557 = vmatmul.msk.bf16.vlgmr.msra.gmra.mxu3 %vm188_vm1, %v1271_v60  ;;  %v1608_v61 = vld [vmem:[%s2202_s10] ss:$0 sm:$0xff] }
 0x898   :  { %v1304_v33 = vpop.f32.mrf.mxu2 }
 0x899   :  { %v1305_v62 = vadd.f32 %v1606_v29, %v1304_v33 }
 0x89b   :  { %1324 = vst.msk [vmem:[%s2213_s21 + $0x8] sm:$0xff] %vm1322_vm5, %v1305_v62 }
 0x8a3   :  { %1558 = vmatmul.msk.bf16.gmra.mxu3 %vm188_vm1, %v1272_v63 }
 0x8fe   :  { %v1307_v41 = vpop.f32.mrf.mxu2 }
 0x8ff   :  { %v1308_v3 = vadd.f32 %v1606_v29, %v1307_v41  ;;  %v1609_v41 = vld [vmem:[%s2203_s11] ss:$0 sm:$0xff] }
 0x901   :  { %1325 = vst.msk [vmem:[%s2213_s21 + $0x10] sm:$0xff] %vm1322_vm5, %v1308_v3 }
 0x906   :  { %v1036_v2 = vpop.f32.mrf.mxu3  ;;  %v1309_v8 = vpop.f32.mrf.mxu2 }
 0x907   :  { %v1041_v9 = vadd.f32 %v1036_v2, %v2048_v0  ;;  %v1310_v10 = vadd.f32 %v1606_v29, %v1309_v8 }
 0x909   :  { %v1047_v11 = vadd.f32 %v1607_v1, %v1041_v9  ;;  %1326 = vst.msk [vmem:[%s2213_s21 + $0x18] sm:$0xff] %vm1322_vm5, %v1310_v10 }
 0x90b   :  { %v1049_v35 = vadd.f32 %v1047_v11, %v1811_v4  ;;  %v1588_v11 = vld [vmem:[%s2206_s14 + $0x18] sm:$0xff] }
 0x90c   :  { %1199 = vmatpush.bf16.msra.mxu1 %v1588_v11 }
 0x90d   :  { %v1051_v43 = vsel %vm96_vm0, %v1049_v35, 0.0 }
 0x90e   :  { %1052 = vadd.xlane.f32.xlu1 %v1051_v43  ;;  %v1038_v55 = vpop.f32.mrf.mxu3  ;;  %v1586_v43 = vld [vmem:[%s2206_s14 + $0x8] sm:$0xff] }
 0x90f   :  { %v1042_v12 = vadd.f32 %v1038_v55, %v2054_v7  ;;  %v1585_v55 = vld [vmem:[%s2206_s14] sm:$0xff] }
 0x911   :  { %v1048_v6 = vadd.f32 %v1607_v1, %v1042_v12 }
 0x913   :  { %v1050_v44 = vadd.f32 %v1048_v6, %v1816_v5  ;;  %v1610_v6 = vld [vmem:[%s2205_s13] ss:$0 sm:$0xff] }
 0x915   :  { %v1054_v0 = vsel %vm96_vm0, %v1050_v44, 0.0 }
 0x916   :  { %v1312_v56 = vpop.f32.mrf.mxu3  ;;  %1055 = vadd.xlane.f32.xlu2 %v1054_v0 }
 0x917   :  { %v1313_v13 = vadd.f32 %v1606_v29, %v1312_v56 }
 0x919   :  { %1327 = vst.msk [vmem:[%s2213_s21 + $0x20] sm:$0xff] %vm1322_vm5, %v1313_v13 }
 0x91e   :  { %v1314_v4 = vpop.f32.mrf.mxu3 }
 0x91f   :  { %v1315_v14 = vadd.f32 %v1606_v29, %v1314_v4 }
 0x921   :  { %1328 = vst.msk [vmem:[%s2213_s21 + $0x28] sm:$0xff] %vm1322_vm5, %v1315_v14 }
 0x926   :  { %v1317_v7 = vpop.f32.mrf.mxu3 }
 0x927   :  { %v1318_v15 = vadd.f32 %v1606_v29, %v1317_v7  ;;  %v1611_v7 = vld [vmem:[%s2207_s15] ss:$0 sm:$0xff]  ;;  %s2233_s15 = sld [smem:[#allocation11_spill]] }
 0x929   :  { %1329 = vst.msk [vmem:[%s2213_s21 + $0x30] sm:$0xff] %vm1322_vm5, %v1318_v15 }
 0x92e   :  { %v1319_v5 = vpop.f32.mrf.mxu3 }
 0x92f   :  { %v1320_v16 = vadd.f32 %v1606_v29, %v1319_v5 }
 0x931   :  { %1330 = vst.msk [vmem:[%s2213_s21 + $0x38] sm:$0xff] %vm1322_vm5, %v1320_v16  ;;  %s1337_s21 = sshll.u32 %s2212_s20, 4  ;;  %s1338_s21 = int_to_ptr.hbm [resolvable:$true] %s1337_s21 }
 0x981   :  { %v1053_v22 = vpop.xlane.xlu1 %1052 }
 0x982   :  { %v1064_v23 = vmul.f32 %v2134_v21, %v1053_v22 }
 0x984   :  { %v1066_v24 = vsub.f32 %v1049_v35, %v1064_v23  ;;  %v1587_v35 = vld [vmem:[%s2206_s14 + $0x10] sm:$0xff] }
 0x985   :  { %1200 = vmatpush.bf16.msra.mxu1 %v1587_v35 }
 0x986   :  { %v1068_v25 = vmul.f32 %v1066_v24, %v1066_v24 }
 0x988   :  { %v1070_v26 = vsel %vm96_vm0, %v1068_v25, 0.0 }
 0x989   :  { %1071 = vadd.xlane.f32.xlu0 %v1070_v26  ;;  %v1056_v30 = vpop.xlane.xlu2 %1055  ;;  %1201 = vmatpush.bf16.msra.mxu1 %v1586_v43 }
 0x98a   :  { %v1065_v31 = vmul.f32 %v2134_v21, %v1056_v30 }
 0x98c   :  { %v1067_v32 = vsub.f32 %v1050_v44, %v1065_v31 }
 0x98d   :  { %1202 = vmatpush.bf16.msra.mxu1 %v1585_v55 }
 0x98e   :  { %v1069_v34 = vmul.f32 %v1067_v32, %v1067_v32 }
 0x990   :  { %v1073_v36 = vsel %vm96_vm0, %v1069_v34, 0.0 }
 0x991   :  { %1074 = vadd.xlane.f32.xlu1 %v1073_v36 }
 0x9fc   :  { %v1072_v38 = vpop.xlane.xlu0 %1071 }
 0x9fd   :  { %v1076_v40 = vmul.f32 %v1072_v38, %v2134_v21 }
 0x9ff   :  { %v1078_v45 = vadd.f32 1e-05, %v1076_v40 }
 0xa01   :  { %1648 = vrsqrt.f32 %v1078_v45  ;;  %vm1086_vm8 = vweird.f32 %v1078_v45 }
 0xa04   :  { %v1075_v46 = vpop.xlane.xlu1 %1074 }
 0xa05   :  { %v1077_v47 = vmul.f32 %v1075_v46, %v2134_v21 }
 0xa07   :  { %v1649_v48 = vpop.eup %1648  ;;  %v1079_v49 = vadd.f32 1e-05, %v1077_v47 }
 0xa08   :  { %v1081_v50 = vmul.f32 %v1649_v48, %v1078_v45  ;;  %vm1087_vm7 = vweird.f32 %v1649_v48 }
 0xa09   :  { %1650 = vrsqrt.f32 %v1079_v49  ;;  %vm1088_vm9 = vmor %vm1086_vm8, %vm1087_vm7  ;;  %vm1096_vm11 = vweird.f32 %v1079_v49 }
 0xa0a   :  { %v1082_v51 = vmul.f32 %v1649_v48, %v1081_v50 }
 0xa0c   :  { %v1083_v52 = vmul.f32 0.5, %v1082_v51 }
 0xa0e   :  { %v1084_v53 = vsub.f32 1.5, %v1083_v52 }
 0xa0f   :  { %v1651_v54 = vpop.eup %1650 }
 0xa10   :  { %v1085_v57 = vmul.f32 %v1649_v48, %v1084_v53  ;;  %v1091_v58 = vmul.f32 %v1651_v54, %v1079_v49  ;;  %vm1097_vm10 = vweird.f32 %v1651_v54 }
 0xa11   :  { %vm1098_vm12 = vmor %vm1096_vm11, %vm1097_vm10 }
 0xa12   :  { %v1092_v39 = vmul.f32 %v1651_v54, %v1091_v58  ;;  %v1089_v29 = vsel %vm1088_vm9, %v1649_v48, %v1085_v57 }
 0xa13   :  { %v1100_v33 = vmul.f32 %v1089_v29, %v1066_v24 }
 0xa14   :  { %v1093_v59 = vmul.f32 0.5, %v1092_v39  ;;  %v1613_v39 = vld [vmem:[%s2209_s17] ss:$0 sm:$0xff]  ;;  %s1684_s17 = smov 128  }
 0xa15   :  { %v1106_v3 = vmul.f32 %v1608_v61, %v1100_v33 }
 0xa16   :  { %v1094_v60 = vsub.f32 1.5, %v1093_v59 }
 0xa17   :  { %v1112_v8 = vadd.f32 %v1609_v41, %v1106_v3 }
 0xa18   :  { %v1095_v62 = vmul.f32 %v1651_v54, %v1094_v60 }
 0xa1a   :  { %v1099_v63 = vsel %vm1098_vm12, %v1651_v54, %v1095_v62  ;;  %v1612_v54 = vld [vmem:[%s2233_s15] ss:$0 sm:$0xff] }
 0xa1b   :  { %v1101_v1 = vmul.f32 %v1099_v63, %v1067_v32 }
 0xa1d   :  { %v1107_v2 = vmul.f32 %v1608_v61, %v1101_v1 }
 0xa1f   :  { %v1113_v9 = vadd.f32 %v1609_v41, %v1107_v2 }
 0xa21   :  { %v1114_v10 = vpack.c.bf16 %v1113_v9, %v1112_v8 }
 0xa23   :  { %1537 = vmatmul.msk.bf16.vlgmr.msra.gmra.mxu0 %vm96_vm0, %v1114_v10 }
 0xaa0   :  { %v1147_v12 = vpop.f32.mrf.mxu0 }
 0xaa1   :  { %v1148_v44 = vadd.f32 %v1610_v6, %v1147_v12 }
 0xaa3   :  { %v1152_v13 = vmax.f32 %v1148_v44, 0.0 }
 0xaa8   :  { %v1149_v0 = vpop.f32.mrf.mxu0 }
 0xaa9   :  { %v1150_v56 = vadd.f32 %v1610_v6, %v1149_v0 }
 0xaab   :  { %v1153_v4 = vmax.f32 %v1150_v56, 0.0 }
 0xaad   :  { %v1154_v14 = vpack.c.bf16 %v1153_v4, %v1152_v13 }
 0xaaf   :  { %1554 = vmatmul.msk.bf16.vlgmr.msra.gmra.mxu1 %vm1191_vm13, %v1154_v14 }
 0xb2c   :  { %v1204_v15 = vpop.f32.mrf.mxu1 }
 0xb2d   :  { %v1205_v5 = vadd.f32 %v1611_v7, %v1204_v15 }
 0xb2f   :  { %v1209_v16 = vadd.f32 %v1205_v5, %v1112_v8 }
 0xb31   :  { %v1211_v27 = vsel %vm96_vm0, %v1209_v16, 0.0 }
 0xb32   :  { %1212 = vadd.xlane.f32.xlu2 %v1211_v27 }
 0xb34   :  { %v1206_v17 = vpop.f32.mrf.mxu1 }
 0xb35   :  { %v1207_v18 = vadd.f32 %v1611_v7, %v1206_v17 }
 0xb37   :  { %v1210_v19 = vadd.f32 %v1207_v18, %v1113_v9 }
 0xb39   :  { %v1214_v20 = vsel %vm96_vm0, %v1210_v19, 0.0 }
 0xb3a   :  { %1215 = vadd.xlane.f32.xlu0 %v1214_v20 }
 0xba5   :  { %v1213_v28 = vpop.xlane.xlu2 %1212 }
 0xba6   :  { %v1217_v22 = vmul.f32 %v1213_v28, %v2134_v21 }
 0xba8   :  { %v1219_v23 = vsub.f32 %v1209_v16, %v1217_v22 }
 0xbaa   :  { %v1221_v24 = vmul.f32 %v1219_v23, %v1219_v23 }
 0xbac   :  { %v1223_v25 = vsel %vm96_vm0, %v1221_v24, 0.0 }
 0xbad   :  { %v1216_v26 = vpop.xlane.xlu0 %1215  ;;  %1224 = vadd.xlane.f32.xlu1 %v1223_v25 }
 0xbae   :  { %v1218_v30 = vmul.f32 %v1216_v26, %v2134_v21 }
 0xbb0   :  { %v1220_v31 = vsub.f32 %v1210_v19, %v1218_v30 }
 0xbb2   :  { %v1222_v32 = vmul.f32 %v1220_v31, %v1220_v31 }
 0xbb4   :  { %v1226_v34 = vsel %vm96_vm0, %v1222_v32, 0.0 }
 0xbb5   :  { %1227 = vadd.xlane.f32.xlu2 %v1226_v34 }
 0xc20   :  { %v1225_v36 = vpop.xlane.xlu1 %1224 }
 0xc21   :  { %v1229_v37 = vmul.f32 %v1225_v36, %v2134_v21 }
 0xc23   :  { %v1231_v38 = vadd.f32 1e-05, %v1229_v37 }
 0xc25   :  { %1652 = vrsqrt.f32 %v1231_v38  ;;  %vm1239_vm15 = vweird.f32 %v1231_v38 }
 0xc28   :  { %v1228_v40 = vpop.xlane.xlu2 %1227 }
 0xc29   :  { %v1230_v42 = vmul.f32 %v1228_v40, %v2134_v21 }
 0xc2b   :  { %v1653_v45 = vpop.eup %1652  ;;  %v1232_v46 = vadd.f32 1e-05, %v1230_v42 }
 0xc2c   :  { %v1234_v47 = vmul.f32 %v1653_v45, %v1231_v38  ;;  %vm1240_vm14 = vweird.f32 %v1653_v45 }
 0xc2d   :  { %1654 = vrsqrt.f32 %v1232_v46  ;;  %vm1241_vm1 = vmor %vm1239_vm15, %vm1240_vm14  ;;  %vm1249_vm3 = vweird.f32 %v1232_v46 }
 0xc2e   :  { %v1235_v48 = vmul.f32 %v1653_v45, %v1234_v47 }
 0xc30   :  { %v1236_v49 = vmul.f32 0.5, %v1235_v48 }
 0xc32   :  { %v1237_v50 = vsub.f32 1.5, %v1236_v49 }
 0xc33   :  { %v1655_v51 = vpop.eup %1654 }
 0xc34   :  { %v1238_v52 = vmul.f32 %v1653_v45, %v1237_v50  ;;  %v1244_v53 = vmul.f32 %v1655_v51, %v1232_v46  ;;  %vm1250_vm2 = vweird.f32 %v1655_v51 }
 0xc35   :  { %vm1251_vm4 = vmor %vm1249_vm3, %vm1250_vm2 }
 0xc36   :  { %v1242_v57 = vsel %vm1241_vm1, %v1653_v45, %v1238_v52  ;;  %v1245_v58 = vmul.f32 %v1655_v51, %v1244_v53 }
 0xc37   :  { %v1253_v21 = vmul.f32 %v1242_v57, %v1219_v23 }
 0xc38   :  { %v1246_v29 = vmul.f32 0.5, %v1245_v58 }
 0xc39   :  { %v1259_v59 = vmul.f32 %v1612_v54, %v1253_v21 }
 0xc3a   :  { %v1247_v60 = vsub.f32 1.5, %v1246_v29 }
 0xc3b   :  { %v1265_v61 = vadd.f32 %v1613_v39, %v1259_v59 }
 0xc3c   :  { %v1248_v33 = vmul.f32 %v1655_v51, %v1247_v60 }
 0xc3d   :  { %1267 = vst.msk [vmem:[#allocation2] sm:$0xff] %vm96_vm0, %v1265_v61 }
 0xc3e   :  { %v1252_v62 = vsel %vm1251_vm4, %v1655_v51, %v1248_v33 }
 0xc3f   :  { %v1254_v63 = vmul.f32 %v1252_v62, %v1220_v31 }
 0xc41   :  { %v1260_v41 = vmul.f32 %v1612_v54, %v1254_v63 }
 0xc43   :  { %v1266_v3 = vadd.f32 %v1613_v39, %v1260_v41 }
 0xc45   :  { %1268 = vst.msk [vmem:[#allocation2 + $0x8] sm:$0xff] %vm96_vm0, %v1266_v3 }
 0xc46   :  { %1343 = dma.vmem_to_hbm [thread:$0]  %s1336_s22, 256, %s1338_s21, [#allocation3], %s1684_s17, %s1684_s17, %s1685_s18  }
 0xc47   :  { %1680 = dma.done.wait [#allocation3], 256  }
 0xc48   :  { %1681 = vsyncadd [#allocation3], 4294967040 }
 0xc49   :  { %1352 = vsyncpa [#allocation3], 1 }

</bundles_post_ra>
